<compile_context>
chip_gen: v7x
topology: tpu7x:2x2x1
jax: 0.10.0
libtpu: 0.0.40
codegen_flags: <defaults>
</compile_context>

<pallas_src>
import math

import jax
import jax.numpy as jnp
from jax.experimental import pallas as pl
from jax.experimental.pallas import tpu as pltpu


_LANE = 128
_MASK = 1e30   # finite "minus infinity" bias for padded memory rows (no NaNs)


def _cdiv(a, b):
    return -(-a // b)


def _round_up(x, m):
    return _cdiv(x, m) * m


def _pick_tiles(dim, max_tile, min_tiles=1):
    """Pick n = cdiv(dim, max_tile) (>= min_tiles) tiles, each a multiple of
    128, minimizing padding.  Returns (tile, n_tiles, padded_dim)."""
    max_tile = max(_LANE, _round_up(max_tile, _LANE))
    n = max(_cdiv(dim, max_tile), min_tiles)
    tile = _round_up(_cdiv(dim, n), _LANE)
    return tile, n, n * tile


def _vmem_tile_bytes(rows, cols, itemsize):
    # (8, 128)-padded VMEM footprint of one buffered tile.
    return _round_up(max(rows, 1), 8) * _round_up(max(cols, 1), _LANE) * itemsize


# ----------------------------------------------------------------------------
# Fused MemoryReader.get_affinity + readout (+ qv concat).
# Online softmax over the memory (THW) axis; affinity never hits HBM.
# ----------------------------------------------------------------------------
def _make_fused_read_kernel(cv, cq, exp_dtype):
    def kernel(mk_ref, qk_ref, asq_ref, mv_ref, qv_ref, out_ref,
               m_sc, l_sc, acc_sc):
        # mk_ref: (CK, tt)   qk_ref: (CK, tq) pre-scaled by 2/sqrt(CK)
        # asq_ref: (tt, 1)   mv_ref: (CV, tt)  qv_ref: (CQ, tq)
        # out_ref: (CV+CQ, tq)
        t = pl.program_id(2)

        @pl.when(t == 0)
        def _init():
            m_sc[...] = jnp.full(m_sc.shape, -jnp.inf, jnp.float32)
            l_sc[...] = jnp.zeros(l_sc.shape, jnp.float32)
            acc_sc[...] = jnp.zeros(acc_sc.shape, jnp.float32)

        # s[m, q] = (2*<mk_m, qk_q> - |mk_m|^2) / sqrt(CK)
        #   qk pre-scaled by 2/sqrt(CK); a_sq precomputed / pre-scaled /
        #   pre-masked (+1e30 on padded memory rows) in the wrapper.
        # mk tile stays lane-dense (CK, tt); the small transpose is fused /
        # handled per-tile instead of an extra HBM pass over mk.
        ab = jnp.dot(mk_ref[...].T, qk_ref[...],
                     preferred_element_type=jnp.float32)           # (tt, tq)
        s = ab - asq_ref[...]                                       # (tt, tq)

        m_prev = m_sc[...]
        m_new = jnp.maximum(m_prev, jnp.max(s, axis=0, keepdims=True))  # (1,tq)
        alpha = jnp.exp(m_prev - m_new)
        # exp_dtype=bf16 is the v6e/v7x EUP-throughput knob; f32 by default.
        p = jnp.exp((s - m_new).astype(exp_dtype))                  # (tt, tq)
        l_sc[...] = alpha * l_sc[...] + jnp.sum(
            p.astype(jnp.float32), axis=0, keepdims=True)
        acc_sc[...] = alpha * acc_sc[...] + jnp.dot(
            mv_ref[...], p.astype(mv_ref.dtype),
            preferred_element_type=jnp.float32)
        m_sc[...] = m_new

        @pl.when(t == pl.num_programs(2) - 1)
        def _finalize():
            # Exact reciprocal: once per output tile, essentially free
            # (approx=True is available if this ever shows in a profile).
            inv_l = pl.reciprocal(l_sc[...], approx=False)
            out_ref[pl.ds(0, cv), :] = (acc_sc[...] * inv_l).astype(out_ref.dtype)
            # Fused torch.cat([mem, qv], dim=1): qv written straight into the
            # output block — no separate HBM concat pass over mem.
            out_ref[pl.ds(cv, cq), :] = qv_ref[...].astype(out_ref.dtype)

    return kernel


def fused_readout(mk, qk, mv, qv, *, thw_tile=1024, hw_tile=1024,
                  exp_dtype=jnp.float32, out_dtype=None):
    """mk (B,CK,T,H,W), qk (B,CK,H,W), mv (B,CVE,T,H,W), qv (B,CQ,H,W)
    -> (B, CVE+CQ, H, W) == cat([readout(get_affinity(mk, qk), mv), qv], 1)."""
    B, CK, T, H, W = mk.shape
    CVE = mv.shape[1]
    CQ = qv.shape[1]
    THW, HW = T * H * W, H * W
    out_dtype = mv.dtype if out_dtype is None else out_dtype

    mk_f = mk.reshape(B, CK, THW)
    qk_f = qk.reshape(B, CK, HW)
    mv_f = mv.reshape(B, CVE, THW)
    qv_f = qv.reshape(B, CQ, HW)

    inv_sqrt_ck = 1.0 / math.sqrt(CK)
    # Fold 2/sqrt(CK) into qk (tiny tensor); precompute a_sq once in f32.
    qk_f = qk_f * jnp.asarray(2.0 * inv_sqrt_ck, qk_f.dtype)
    a_sq = jnp.sum(jnp.square(mk_f.astype(jnp.float32)), axis=1) * inv_sqrt_ck

    # Memory (THW) axis: reduction, innermost.  Query (HW) axis: parallel;
    # keep >= 2 tiles at B=1 so both v7x TensorCores get work.
    min_q_tiles = 2 if (B == 1 and HW > 256) else 1
    tt, n_t, THW_pad = _pick_tiles(THW, thw_tile)
    tq, n_q, HW_pad = _pick_tiles(HW, hw_tile, min_tiles=min_q_tiles)

    # Pad to tile-aligned sizes (real STCN HW/THW are never 128-aligned);
    # padded memory rows are masked out of the softmax via a_sq = +1e30.
    # TODO(synk): emit pre-padded layouts from encode_key/encode_value upstream
    #             to avoid these pad copies in production.
    if THW_pad != THW:
        pad = THW_pad - THW
        mk_f = jnp.pad(mk_f, ((0, 0), (0, 0), (0, pad)))
        mv_f = jnp.pad(mv_f, ((0, 0), (0, 0), (0, pad)))
        a_sq = jnp.pad(a_sq, ((0, 0), (0, pad)), constant_values=_MASK)
    if HW_pad != HW:
        pad = HW_pad - HW
        qk_f = jnp.pad(qk_f, ((0, 0), (0, 0), (0, pad)))
        qv_f = jnp.pad(qv_f, ((0, 0), (0, 0), (0, pad)))
    a_sq = a_sq[:, :, None]                              # (B, THW_pad, 1) f32

    # Explicit VMEM budget: double-buffered tiles + f32 acc + (tt, tq) f32
    # s/p temporaries (the easy-to-forget cost on v7x's 64 MiB VMEM).
    isz_k = jnp.dtype(mk_f.dtype).itemsize
    isz_v = jnp.dtype(mv_f.dtype).itemsize
    isz_o = jnp.dtype(out_dtype).itemsize
    budget = (2 * _vmem_tile_bytes(CK, tt, isz_k)            # mk
              + 2 * _vmem_tile_bytes(CK, tq, isz_k)          # qk
              + 2 * _vmem_tile_bytes(tt, 1, 4)               # a_sq
              + 2 * _vmem_tile_bytes(CVE, tt, isz_v)         # mv
              + 2 * _vmem_tile_bytes(CQ, tq, isz_v)          # qv
              + 2 * _vmem_tile_bytes(CVE + CQ, tq, isz_o)    # out
              + 2 * _vmem_tile_bytes(1, tq, 4)               # m, l scratch
              + _vmem_tile_bytes(CVE, tq, 4)                 # acc scratch
              + 4 * _vmem_tile_bytes(tt, tq, 4))             # s/p/exp temps
    vmem_limit = int(min(max(1.5 * budget + (4 << 20), 32 << 20), 100 << 20))

    kernel = _make_fused_read_kernel(CVE, CQ, exp_dtype)
    out = pl.pallas_call(
        kernel,
        out_shape=jax.ShapeDtypeStruct((B, CVE + CQ, HW_pad), out_dtype),
        grid=(B, n_q, n_t),
        in_specs=[
            pl.BlockSpec((None, CK, tt), lambda b, q, t: (b, 0, t)),   # mk
            pl.BlockSpec((None, CK, tq), lambda b, q, t: (b, 0, q)),   # qk
            pl.BlockSpec((None, tt, 1), lambda b, q, t: (b, t, 0)),    # a_sq
            pl.BlockSpec((None, CVE, tt), lambda b, q, t: (b, 0, t)),  # mv
            pl.BlockSpec((None, CQ, tq), lambda b, q, t: (b, 0, q)),   # qv
        ],
        out_specs=pl.BlockSpec((None, CVE + CQ, tq), lambda b, q, t: (b, 0, q)),
        scratch_shapes=[
            pltpu.VMEM((1, tq), jnp.float32),      # running max
            pltpu.VMEM((1, tq), jnp.float32),      # running sum
            pltpu.VMEM((CVE, tq), jnp.float32),    # readout accumulator
        ],
        compiler_params=pltpu.CompilerParams(
            dimension_semantics=("parallel", "parallel", "arbitrary"),
            vmem_limit_bytes=vmem_limit),
    )(mk_f, qk_f, a_sq, mv_f, qv_f)

    if HW_pad != HW:
        out = out[:, :, :HW]
    return out.reshape(B, CVE + CQ, H, W)


def readout(mk, qk, mv, qv, **kwargs):
    """MemoryReader.get_affinity + readout, fused.
    mv (B, CV, T, H, W)    -> (B, CV+CQ, H, W)               (single object)
    mv (B, O, CV, T, H, W) -> tuple of O (B, CV+CQ, H, W): objects are stacked
    along CV so the shared affinity / exp / online-softmax work runs once."""
    if mv.ndim == 5:
        return fused_readout(mk, qk, mv, qv, **kwargs)
    B, O, CV, T, H, W = mv.shape
    full = fused_readout(mk, qk, mv.reshape(B, O * CV, T, H, W), qv, **kwargs)
    qv_tail = full[:, O * CV:]
    return tuple(
        jnp.concatenate([full[:, o * CV:(o + 1) * CV], qv_tail], axis=1)
        for o in range(O))


# ----------------------------------------------------------------------------
# STCN.aggregate (+ trailing softmax of segment()), lane-dense (K, H*W).
# ----------------------------------------------------------------------------
def _aggregate_kernel(prob_ref, logits_ref, prob_out_ref):
    # prob_ref: (K, tq)  logits_ref: (K+1, tq)  prob_out_ref: (K, tq)
    eps = 1e-7
    p = prob_ref[...].astype(jnp.float32)
    K = p.shape[0]

    # torch.prod(1 - prob, dim=1): K is tiny & static -> unrolled multiplies.
    bg = 1.0 - p[0:1, :]
    for i in range(1, K):
        bg = bg * (1.0 - p[i:i + 1, :])
    bg = jnp.clip(bg, eps, 1.0 - eps)
    fg = jnp.clip(p, eps, 1.0 - eps)

    # logit(x) = log(x) - log(1-x): EUP logs, no full-tile divide.
    logit_bg = jnp.log(bg) - jnp.log(1.0 - bg)          # (1, tq)
    logit_fg = jnp.log(fg) - jnp.log(1.0 - fg)          # (K, tq)

    # Write bg / fg rows separately: no in-kernel concatenate / (K+1) copy.
    logits_ref[pl.ds(0, 1), :] = logit_bg.astype(logits_ref.dtype)
    logits_ref[pl.ds(1, K), :] = logit_fg.astype(logits_ref.dtype)

    # prob = softmax(logits, dim=channel)[1:]  (exact divide: mem-bound kernel)
    m = jnp.maximum(jnp.max(logit_fg, axis=0, keepdims=True), logit_bg)
    e_bg = jnp.exp(logit_bg - m)
    e_fg = jnp.exp(logit_fg - m)
    denom = e_bg + jnp.sum(e_fg, axis=0, keepdims=True)
    prob_out_ref[...] = (e_fg / denom).astype(prob_out_ref.dtype)


def aggregate_and_softmax(prob, *, hw_tile=2048):
    """prob (B, K, H, W) -> (logits (B, K+1, H, W), prob (B, K, H, W))."""
    B, K, H, W = prob.shape
    HW = H * W
    tq, n_q, HW_pad = _pick_tiles(HW, hw_tile)
    prob_f = prob.reshape(B, K, HW)
    if HW_pad != HW:
        prob_f = jnp.pad(prob_f, ((0, 0), (0, 0), (0, HW_pad - HW)))

    logits, prob_out = pl.pallas_call(
        _aggregate_kernel,
        out_shape=(jax.ShapeDtypeStruct((B, K + 1, HW_pad), jnp.float32),
                   jax.ShapeDtypeStruct((B, K, HW_pad), jnp.float32)),
        grid=(B, n_q),
        in_specs=[pl.BlockSpec((None, K, tq), lambda b, q: (b, 0, q))],
        out_specs=(pl.BlockSpec((None, K + 1, tq), lambda b, q: (b, 0, q)),
                   pl.BlockSpec((None, K, tq), lambda b, q: (b, 0, q))),
        compiler_params=pltpu.CompilerParams(
            dimension_semantics=("parallel", "parallel")),
    )(prob_f)

    if HW_pad != HW:
        logits, prob_out = logits[:, :, :HW], prob_out[:, :, :HW]
    return logits.reshape(B, K + 1, H, W), prob_out.reshape(B, K, H, W)


# ----------------------------------------------------------------------------
# Pure-JAX references (mirror the PyTorch math exactly) for verification.
# ----------------------------------------------------------------------------
def ref_affinity(mk, qk):
    B, CK = mk.shape[:2]
    mkf = mk.reshape(B, CK, -1)
    qkf = qk.reshape(B, CK, -1)
    a_sq = jnp.sum(mkf ** 2, axis=1)[:, :, None]
    ab = jnp.einsum("bct,bcq->btq", mkf, qkf)
    aff = (2.0 * ab - a_sq) / math.sqrt(CK)
    return jax.nn.softmax(aff, axis=1)


def ref_readout(mk, qk, mv, qv):
    aff = ref_affinity(mk, qk)
    B, CV = mv.shape[:2]
    H, W = qk.shape[-2:]
    mem = jnp.einsum("bct,btq->bcq", mv.reshape(B, CV, -1), aff)
    return jnp.concatenate([mem.reshape(B, CV, H, W), qv], axis=1)


def ref_aggregate_and_softmax(prob):
    bg = jnp.prod(1.0 - prob, axis=1, keepdims=True)
    new_prob = jnp.clip(jnp.concatenate([bg, prob], axis=1), 1e-7, 1.0 - 1e-7)
    logits = jnp.log(new_prob / (1.0 - new_prob))
    return logits, jax.nn.softmax(logits, axis=1)[:, 1:]


# ----------------------------------------------------------------------------
if __name__ == "__main__":
    key = jax.random.PRNGKey(0)
    kmk, kqk, kmv, kqv, kpr = jax.random.split(key, 5)

    # Small shapes consistent with STCN.segment() (real: CK=64, CV=CQ=512).
    # H*W = 120 and T*H*W = 360 are deliberately NOT 128-aligned so the demo
    # exercises the pad + mask path used at production resolutions.
    B, CK, CV, CQ, T, H, W = 2, 16, 32, 32, 3, 10, 12
    O, K = 2, 2

    mk = jax.random.normal(kmk, (B, CK, T, H, W), dtype=jnp.float32)
    qk = jax.random.normal(kqk, (B, CK, H, W), dtype=jnp.float32)
    mv = jax.random.normal(kmv, (B, O, CV, T, H, W), dtype=jnp.float32)
    qv = jax.random.normal(kqv, (B, CQ, H, W), dtype=jnp.float32)
    prob_in = jax.nn.sigmoid(
        jax.random.normal(kpr, (B, K, H, W), dtype=jnp.float32))

    # Fused affinity + readout for both objects in ONE pass (stacked along CV);
    # small tiles so the demo runs a multi-tile online softmax over THW and
    # hits the padded/masked last memory tile.
    outs = readout(mk, qk, mv, qv, thw_tile=256, hw_tile=128)
    logits, prob_out = aggregate_and_softmax(prob_in, hw_tile=128)
    jax.block_until_ready((outs, logits, prob_out))

    # --- verify against pure-JAX references --------------------------------
    for o in range(O):
        want = ref_readout(mk, qk, mv[:, o], qv)
        err = float(jnp.max(jnp.abs(outs[o] - want)))
        assert jnp.allclose(outs[o], want, atol=2e-3, rtol=2e-3), err

    logits_want, prob_want = ref_aggregate_and_softmax(prob_in)
    assert jnp.allclose(logits, logits_want, atol=1e-4, rtol=1e-4), \
        float(jnp.max(jnp.abs(logits - logits_want)))
    assert jnp.allclose(prob_out, prob_want, atol=1e-3, rtol=1e-3), \
        float(jnp.max(jnp.abs(prob_out - prob_want)))

    print("KERNEL_OK")
</pallas_src>

<mosaic_0001>
module attributes {stable_mosaic.version = 11 : i64} {
  func.func @kernel(%arg0: i32, %arg1: i32, %arg2: i32, %arg3: memref<1x16x256xf32, #tpu.memory_space<vmem>>, %arg4: memref<1x16x128xf32, #tpu.memory_space<vmem>>, %arg5: memref<1x256x1xf32, #tpu.memory_space<vmem>>, %arg6: memref<1x64x256xf32, #tpu.memory_space<vmem>>, %arg7: memref<1x32x128xf32, #tpu.memory_space<vmem>>, %arg8: memref<1x96x128xf32, #tpu.memory_space<vmem>>, %arg9: memref<1x128xf32, #tpu.memory_space<vmem>>, %arg10: memref<1x128xf32, #tpu.memory_space<vmem>>, %arg11: memref<64x128xf32, #tpu.memory_space<vmem>>) attributes {dimension_semantics = [#tpu.dimension_semantics<parallel>, #tpu.dimension_semantics<parallel>, #tpu.dimension_semantics<arbitrary>], iteration_bounds = array<i64: 2, 1, 2>, scalar_prefetch = 0 : i64, scratch_operands = 3 : i64, tpu.core_type = #tpu.core_type<tc>, window_params = [{transform_indices = @transform_0, window_bounds = array<i64: 1, 16, 256>}, {transform_indices = @transform_1, window_bounds = array<i64: 1, 16, 128>}, {transform_indices = @transform_2, window_bounds = array<i64: 1, 256, 1>}, {transform_indices = @transform_3, window_bounds = array<i64: 1, 64, 256>}, {transform_indices = @transform_4, window_bounds = array<i64: 1, 32, 128>}, {transform_indices = @transform_5, window_bounds = array<i64: 1, 96, 128>}]} {
    %c0_i32 = arith.constant 0 : i32
    %0 = arith.cmpi eq, %arg2, %c0_i32 : i32
    %1 = arith.extui %0 : i1 to i32
    %c0_i32_0 = arith.constant 0 : i32
    %2 = arith.cmpi ne, %1, %c0_i32_0 : i32
    scf.if %2 {
      %cst_28 = arith.constant 0xFF800000 : f32
      %40 = vector.broadcast %cst_28 : f32 to vector<1x128xf32>
      %c0_29 = arith.constant 0 : index
      %c0_30 = arith.constant 0 : index
      %41 = vector.load %arg9[%c0_29, %c0_30] : memref<1x128xf32, #tpu.memory_space<vmem>>, vector<1x128xf32>
      tpu.vector_store %arg9[%c0_29, %c0_30], %40 {strides = array<i32>} : memref<1x128xf32, #tpu.memory_space<vmem>>, vector<1x128xf32>,
      %cst_31 = arith.constant 0.000000e+00 : f32
      %42 = vector.broadcast %cst_31 : f32 to vector<1x128xf32>
      %c0_32 = arith.constant 0 : index
      %c0_33 = arith.constant 0 : index
      %43 = vector.load %arg10[%c0_32, %c0_33] : memref<1x128xf32, #tpu.memory_space<vmem>>, vector<1x128xf32>
      tpu.vector_store %arg10[%c0_32, %c0_33], %42 {strides = array<i32>} : memref<1x128xf32, #tpu.memory_space<vmem>>, vector<1x128xf32>,
      %cst_34 = arith.constant 0.000000e+00 : f32
      %44 = vector.broadcast %cst_34 : f32 to vector<64x128xf32>
      %c0_35 = arith.constant 0 : index
      %c0_36 = arith.constant 0 : index
      %45 = vector.load %arg11[%c0_35, %c0_36] : memref<64x128xf32, #tpu.memory_space<vmem>>, vector<64x128xf32>
      tpu.vector_store %arg11[%c0_35, %c0_36], %44 {strides = array<i32>} : memref<64x128xf32, #tpu.memory_space<vmem>>, vector<64x128xf32>,
    } else {
    }
    %c0 = arith.constant 0 : index
    %c0_1 = arith.constant 0 : index
    %c0_2 = arith.constant 0 : index
    %3 = vector.load %arg3[%c0, %c0_1, %c0_2] : memref<1x16x256xf32, #tpu.memory_space<vmem>>, vector<1x16x256xf32>
    %4 = vector.shape_cast %3 : vector<1x16x256xf32> to vector<16x256xf32>
    %5 = tpu.transpose %4, [1, 0] : vector<16x256xf32> -> vector<256x16xf32>
    %c0_3 = arith.constant 0 : index
    %c0_4 = arith.constant 0 : index
    %c0_5 = arith.constant 0 : index
    %6 = vector.load %arg4[%c0_3, %c0_4, %c0_5] : memref<1x16x128xf32, #tpu.memory_space<vmem>>, vector<1x16x128xf32>
    %7 = vector.shape_cast %6 : vector<1x16x128xf32> to vector<16x128xf32>
    %cst = arith.constant dense<0.000000e+00> : vector<256x128xf32>
    %8 = tpu.matmul %5, %7, %cst {dimension_numbers = #tpu.dot_dimension_numbers<[1], [0], [0], [1], [0, 0, 1, 1], [], []>} : vector<256x16xf32>, vector<16x128xf32>, vector<256x128xf32> -> vector<256x128xf32>
    %c0_6 = arith.constant 0 : index
    %c0_7 = arith.constant 0 : index
    %c0_8 = arith.constant 0 : index
    %9 = vector.load %arg5[%c0_6, %c0_7, %c0_8] : memref<1x256x1xf32, #tpu.memory_space<vmem>>, vector<1x256x1xf32>
    %10 = vector.shape_cast %9 : vector<1x256x1xf32> to vector<256x1xf32>
    %11 = vector.broadcast %10 : vector<256x1xf32> to vector<256x128xf32>
    %12 = arith.subf %8, %11 : vector<256x128xf32>
    %c0_9 = arith.constant 0 : index
    %c0_10 = arith.constant 0 : index
    %13 = vector.load %arg9[%c0_9, %c0_10] : memref<1x128xf32, #tpu.memory_space<vmem>>, vector<1x128xf32>
    %cst_11 = arith.constant dense<0xFF800000> : vector<128xf32>
    %14 = vector.multi_reduction <maximumf>, %12, %cst_11 [0] : vector<256x128xf32> to vector<128xf32>
    %15 = vector.shape_cast %14 : vector<128xf32> to vector<1x128xf32>
    %16 = arith.maximumf %13, %15 : vector<1x128xf32>
    %17 = arith.subf %13, %16 : vector<1x128xf32>
    %18 = math.exp %17 : vector<1x128xf32>
    %19 = vector.broadcast %16 : vector<1x128xf32> to vector<256x128xf32>
    %20 = arith.subf %12, %19 : vector<256x128xf32>
    %21 = math.exp %20 : vector<256x128xf32>
    %c0_12 = arith.constant 0 : index
    %c0_13 = arith.constant 0 : index
    %22 = vector.load %arg10[%c0_12, %c0_13] : memref<1x128xf32, #tpu.memory_space<vmem>>, vector<1x128xf32>
    %23 = arith.mulf %18, %22 : vector<1x128xf32>
    %cst_14 = arith.constant dense<0.000000e+00> : vector<128xf32>
    %24 = vector.multi_reduction <add>, %21, %cst_14 [0] : vector<256x128xf32> to vector<128xf32>
    %25 = vector.shape_cast %24 : vector<128xf32> to vector<1x128xf32>
    %26 = arith.addf %23, %25 : vector<1x128xf32>
    %c0_15 = arith.constant 0 : index
    %c0_16 = arith.constant 0 : index
    %27 = vector.load %arg10[%c0_15, %c0_16] : memref<1x128xf32, #tpu.memory_space<vmem>>, vector<1x128xf32>
    tpu.vector_store %arg10[%c0_15, %c0_16], %26 {strides = array<i32>} : memref<1x128xf32, #tpu.memory_space<vmem>>, vector<1x128xf32>,
    %c0_17 = arith.constant 0 : index
    %c0_18 = arith.constant 0 : index
    %28 = vector.load %arg11[%c0_17, %c0_18] : memref<64x128xf32, #tpu.memory_space<vmem>>, vector<64x128xf32>
    %29 = vector.broadcast %18 : vector<1x128xf32> to vector<64x128xf32>
    %30 = arith.mulf %29, %28 : vector<64x128xf32>
    %c0_19 = arith.constant 0 : index
    %c0_20 = arith.constant 0 : index
    %c0_21 = arith.constant 0 : index
    %31 = vector.load %arg6[%c0_19, %c0_20, %c0_21] : memref<1x64x256xf32, #tpu.memory_space<vmem>>, vector<1x64x256xf32>
    %32 = vector.shape_cast %31 : vector<1x64x256xf32> to vector<64x256xf32>
    %cst_22 = arith.constant dense<0.000000e+00> : vector<64x128xf32>
    %33 = tpu.matmul %32, %21, %cst_22 {dimension_numbers = #tpu.dot_dimension_numbers<[1], [0], [0], [1], [0, 0, 1, 1], [], []>} : vector<64x256xf32>, vector<256x128xf32>, vector<64x128xf32> -> vector<64x128xf32>
    %34 = arith.addf %30, %33 : vector<64x128xf32>
    %c0_23 = arith.constant 0 : index
    %c0_24 = arith.constant 0 : index
    %35 = vector.load %arg11[%c0_23, %c0_24] : memref<64x128xf32, #tpu.memory_space<vmem>>, vector<64x128xf32>
    tpu.vector_store %arg11[%c0_23, %c0_24], %34 {strides = array<i32>} : memref<64x128xf32, #tpu.memory_space<vmem>>, vector<64x128xf32>,
    %c0_25 = arith.constant 0 : index
    %c0_26 = arith.constant 0 : index
    %36 = vector.load %arg9[%c0_25, %c0_26] : memref<1x128xf32, #tpu.memory_space<vmem>>, vector<1x128xf32>
    tpu.vector_store %arg9[%c0_25, %c0_26], %16 {strides = array<i32>} : memref<1x128xf32, #tpu.memory_space<vmem>>, vector<1x128xf32>,
    %c1_i32 = arith.constant 1 : i32
    %37 = arith.cmpi eq, %arg2, %c1_i32 : i32
    %38 = arith.extui %37 : i1 to i32
    %c0_i32_27 = arith.constant 0 : i32
    %39 = arith.cmpi ne, %38, %c0_i32_27 : i32
    scf.if %39 {
      %c0_28 = arith.constant 0 : index
      %c0_29 = arith.constant 0 : index
      %40 = vector.load %arg10[%c0_28, %c0_29] : memref<1x128xf32, #tpu.memory_space<vmem>>, vector<1x128xf32>
      %41 = tpu.reciprocal %40 : vector<1x128xf32> -> vector<1x128xf32>
      %c0_30 = arith.constant 0 : index
      %c0_31 = arith.constant 0 : index
      %42 = vector.load %arg11[%c0_30, %c0_31] : memref<64x128xf32, #tpu.memory_space<vmem>>, vector<64x128xf32>
      %43 = vector.broadcast %41 : vector<1x128xf32> to vector<64x128xf32>
      %44 = arith.mulf %42, %43 : vector<64x128xf32>
      %c0_32 = arith.constant 0 : index
      %c0_33 = arith.constant 0 : index
      %c0_34 = arith.constant 0 : index
      %45 = vector.load %arg8[%c0_32, %c0_33, %c0_34] : memref<1x96x128xf32, #tpu.memory_space<vmem>>, vector<1x64x128xf32>
      %46 = vector.shape_cast %45 : vector<1x64x128xf32> to vector<64x128xf32>
      %47 = vector.shape_cast %44 : vector<64x128xf32> to vector<1x64x128xf32>
      tpu.vector_store %arg8[%c0_32, %c0_33, %c0_34], %47 {strides = array<i32>} : memref<1x96x128xf32, #tpu.memory_space<vmem>>, vector<1x64x128xf32>,
      %c0_35 = arith.constant 0 : index
      %c0_36 = arith.constant 0 : index
      %c0_37 = arith.constant 0 : index
      %48 = vector.load %arg7[%c0_35, %c0_36, %c0_37] : memref<1x32x128xf32, #tpu.memory_space<vmem>>, vector<1x32x128xf32>
      %49 = vector.shape_cast %48 : vector<1x32x128xf32> to vector<32x128xf32>
      %c0_38 = arith.constant 0 : index
      %c64 = arith.constant 64 : index
      %c0_39 = arith.constant 0 : index
      %50 = vector.load %arg8[%c0_38, %c64, %c0_39] : memref<1x96x128xf32, #tpu.memory_space<vmem>>, vector<1x32x128xf32>
      %51 = vector.shape_cast %50 : vector<1x32x128xf32> to vector<32x128xf32>
      %52 = vector.shape_cast %49 : vector<32x128xf32> to vector<1x32x128xf32>
      tpu.vector_store %arg8[%c0_38, %c64, %c0_39], %52 {strides = array<i32>} : memref<1x96x128xf32, #tpu.memory_space<vmem>>, vector<1x32x128xf32>,
    } else {
    }
    return
  }
  func.func @transform_0(%arg0: i32, %arg1: i32, %arg2: i32) -> (i32, i32, i32) {
    %c0_i32 = arith.constant 0 : i32
    %c0_i32_0 = arith.constant 0 : i32
    return %arg0, %c0_i32, %arg2 : i32, i32, i32
  }
  func.func @transform_1(%arg0: i32, %arg1: i32, %arg2: i32) -> (i32, i32, i32) {
    %c0_i32 = arith.constant 0 : i32
    %c0_i32_0 = arith.constant 0 : i32
    return %arg0, %c0_i32, %arg1 : i32, i32, i32
  }
  func.func @transform_2(%arg0: i32, %arg1: i32, %arg2: i32) -> (i32, i32, i32) {
    %c0_i32 = arith.constant 0 : i32
    %c0_i32_0 = arith.constant 0 : i32
    return %arg0, %arg2, %c0_i32 : i32, i32, i32
  }
  func.func @transform_3(%arg0: i32, %arg1: i32, %arg2: i32) -> (i32, i32, i32) {
    %c0_i32 = arith.constant 0 : i32
    %c0_i32_0 = arith.constant 0 : i32
    return %arg0, %c0_i32, %arg2 : i32, i32, i32
  }
  func.func @transform_4(%arg0: i32, %arg1: i32, %arg2: i32) -> (i32, i32, i32) {
    %c0_i32 = arith.constant 0 : i32
    %c0_i32_0 = arith.constant 0 : i32
    return %arg0, %c0_i32, %arg1 : i32, i32, i32
  }
  func.func @transform_5(%arg0: i32, %arg1: i32, %arg2: i32) -> (i32, i32, i32) {
    %c0_i32 = arith.constant 0 : i32
    %c0_i32_0 = arith.constant 0 : i32
    return %arg0, %c0_i32, %arg1 : i32, i32, i32
  }
}

</mosaic_0001>

<bundles_post_ra>
// kernel: tpu_custom_call.1
= control target key start
LH: loop header
LB: loop body
LE: loop exit
PB: predicated region body
PF: predicated region fallthrough
CT: control target
= control target key end

     0   :  { %s2816_s0 = inlined_call_operand.vmem [shape: f32[2,16,512], index: 0, kind: input, shape index: {}]   ;;  %s2817_s1 = inlined_call_operand.vmem [shape: f32[2,16,128], index: 1, kind: input, shape index: {}]   ;;  %s2818_s2 = inlined_call_operand.vmem [shape: f32[2,512,1], index: 2, kind: input, shape index: {}]   ;;  %s2819_s3 = inlined_call_operand.vmem [shape: f32[2,64,512], index: 3, kind: input, shape index: {}]   ;;  %s2820_s4 = inlined_call_operand.vmem [shape: f32[2,32,128], index: 4, kind: input, shape index: {}]   ;;  %s2821_s5 = inlined_call_operand.hbm [shape: f32[2,96,128], index: 5, kind: output, shape index: {}]  }
   0x1   :  { %2831 = sst [smem:[#allocation20_spill]] %s2816_s0 }
   0x2   :  { %2832 = sst [smem:[#allocation21_spill]] %s2819_s3 }
   0x3   :  { %10 = vsyncpa [#allocation8], 0 }
   0x4   :  { %12 = vsyncpa [#allocation8 + $0x1], 0  ;;  %s2196_s18 = smov 0   ;;  %s2198_s19 = smov 0  }
   0x5   :  { %s2200_s20 = smov 0   ;;  %s2202_s21 = smov 0  }
   0x6   :  { %s2204_s22 = smov 0   ;;  %s2206_s23 = smov 0  }
   0x7   :  { %s2208_s24 = smov 0   ;;  %s2210_s25 = smov 0  }
   0x8   :  { %s2212_s26 = smov 0   ;;  %s2214_s27 = smov 0  }
   0x9 LB: > { %2833 = sst [smem:[#allocation10_spill]] %s2122_s18  ;;  %s1644_s28 = sadd.s32 4294967295, %s2158_s27   ;;  %s2158_s27 = sphi %s2214_s27, %s18_s27   ;;  %s2154_s26 = sphi %s2212_s26, %s2858_s26   ;;  %s2150_s25 = sphi %s2210_s25, %s2857_s25   ;;  %s2146_s24 = sphi %s2208_s24, %s2856_s24   ;;  %s2142_s23 = sphi %s2206_s23, %s2855_s23   ;;  %s2138_s22 = sphi %s2204_s22, %s2854_s22   ;;  %s2134_s21 = sphi %s2202_s21, %s2853_s21   ;;  %s2130_s20 = sphi %s2200_s20, %s2852_s20   ;;  %s2126_s19 = sphi %s2198_s19, %s2860_s19   ;;  %s2122_s18 = sphi %s2196_s18, %s2859_s18  }
   0xa   : > { %2834 = sst [smem:[#allocation11_spill]] %s2130_s20  ;;  %s1645_s29 = sadd.s32 4294967294, %s2158_s27  }
   0xb   : > { %2835 = sst [smem:[#allocation12_spill]] %s2138_s22  ;;  %s30_s30 = sadd.s32 1, %s2150_s25 }
   0xc   : > { %2836 = sst [smem:[#allocation13_spill]] %s2150_s25  ;;  %s37_s6 = sadd.s32 1, %s2154_s26 }
   0xd   : > { %2837 = sst [smem:[#allocation14_spill]] %s2154_s26  ;;  %p31_p0 = scmp.ge.s32.totalorder %s30_s30, 2 }
   0xe   : > { %s46_s7 = sadd.s32 1, %s2138_s22  ;;  %p53_p1 = scmp.ne.s32.totalorder %s2138_s22, %s2134_s21 }
   0xf   : > { %p54_p2 = scmp.eq.s32.totalorder %s2158_s27, 0  ;;  %s2862_s30 = smov (%p31_p0, %s30_s30), 0 }
  0x10   : > { %2838 = sst [smem:[#allocation15_spill]] %s2862_s30  ;;  %s2864_s6 = smov (!%p31_p0, %s37_s6), %s2154_s26 }
  0x11   : > { %s42_s8 = ssub.s32 %s2150_s25, %s2862_s30  ;;  %p2259_p3 = por %p54_p2, %p53_p1 }
  0x12   : > { %p39_p4 = scmp.ge.s32.totalorder %s2864_s6, 2  ;;  %s186_s10 = sadd.s32 1, %s2130_s20 }
  0x13   : > { %p196_p5 = scmp.ne.s32.totalorder %s2130_s20, %s2126_s19  ;;  %p197_p6 = scmp.eq.s32.totalorder %s1644_s28, 3 }
  0x14   : > { %s2866_s6 = smov (%p39_p4, %s2864_s6), 0  ;;  %p202_p8 = scmp.ne.s32.totalorder %s2126_s19, %s2122_s18 }
  0x15   : > { %2840 = sst [smem:[#allocation16_spill]] %s2866_s6  ;;  %p2268_p7 = por %p197_p6, %p196_p5 }
  0x16   : > { %s41_s12 = ssub.s32 %s2154_s26, %s2866_s6  ;;  %p203_p9 = scmp.eq.s32.totalorder %s1645_s29, 3 }
  0x17   : > { %s43_s13 = sor.u32 %s42_s8, %s41_s12  ;;  %p184_p10 = scmp.eq.s32.totalorder %s41_s12, 0 }
  0x18   : > { %p44_p11 = scmp.eq.s32.totalorder %s43_s13, 0  ;;  %p2276_p12 = por %p203_p9, %p202_p8 }
  0x19   : > { %s2281_s15 = scalar_select %p184_p10, %s2130_s20, %s186_s10  }
  0x1a   : > { %s2842_s14 = scalar_select %p2276_p12, 1, 0 }
  0x1b   : > { %2844 = sst [smem:[#allocation18_spill]] %s2281_s15  ;;  %p1647_p13 = scmp.ge.s32.totalorder %s2158_s27, 4 }
  0x1c   : > { %2843 = sst [smem:[#allocation17_spill]] %s2842_s14 }
  0x1d   : > { %s2284_s16 = scalar_select %p44_p11, %s2138_s22, %s46_s7  }
  0x1e   : > { %219 = sbr.rel (%p1647_p13) target bundleno = 67 (0x43), region = 16 }
  0x1f   : > { %2845 = sst [smem:[#allocation19_spill]] %s2284_s16 }
  0x25   : > { %222 = sbr.rel (!%p2259_p3) target bundleno = 49 (0x31), region = 20  ;;  %s224_s17 = sand.u32 (%p2259_p3), 1, %s2138_s22  }
  0x26   : > { %s1649_s28 = sshll.u32 (%p2259_p3), %s2150_s25, 1  ;;  %s1648_s29 = sshll.u32 (%p2259_p3), %s224_s17, 5 }
  0x27   : > { %s1650_s8 = sshll.u32 (%p2259_p3), %s2154_s26, 3  ;;  %s2846_s0 = sld [smem:[#allocation20_spill]] (%p2259_p3) }
  0x28   : > { %s229_s12 = sadd.s32 (%p2259_p3), %s1650_s8, %s1649_s28  ;;  %s226_s30 = scalar_lea.vmem (%p2259_p3), [#allocation5], %s1648_s29 }
  0x29   : > { %s1651_s13 = sshll.u32 (%p2259_p3), %s229_s12, 3 }
  0x2d   : > { %s231_s7 = scalar_lea.vmem %s2846_s0, %s1651_s13 }
  0x2e   : > { %v244_v0 = vld [vmem:[%s231_s7] sm:$0xff]  ;;  %v246_v1 = vld [vmem:[%s231_s7 + $0x8] sm:$0xff] }
  0x2f   : > { %v248_v2 = vld [vmem:[%s231_s7 + $0x20] sm:$0xff]  ;;  %245 = vst [vmem:[%s226_s30] sm:$0xff] %v244_v0  ;;  %247 = vst [vmem:[%s226_s30 + $0x8] sm:$0xff] %v246_v1  ;;  %v250_v3 = vld [vmem:[%s231_s7 + $0x28] sm:$0xff] }
  0x30   : > { %249 = vst [vmem:[%s226_s30 + $0x10] sm:$0xff] %v248_v2  ;;  %251 = vst [vmem:[%s226_s30 + $0x18] sm:$0xff] %v250_v3 }
  0x31 PF: > { %281 = sbr.rel (!%p2259_p3) target bundleno = 67 (0x43), region = 51  ;;  %s283_s17 = sand.u32 (%p2259_p3), 1, %s2138_s22  }
  0x32   : > { %s1653_s28 = sshll.u32 (%p2259_p3), %s2150_s25, 1  ;;  %s1652_s6 = sshll.u32 (%p2259_p3), %s283_s17, 7 }
  0x33   : > { %s1654_s8 = sshll.u32 (%p2259_p3), %s2154_s26, 5  ;;  %s2847_s3 = sld [smem:[#allocation21_spill]] (%p2259_p3) }
  0x34   : > { %s288_s12 = sadd.s32 (%p2259_p3), %s1654_s8, %s1653_s28  ;;  %s285_s30 = scalar_lea.vmem (%p2259_p3), [#allocation6], %s1652_s6 }
  0x35   : > { %s1655_s13 = sshll.u32 (%p2259_p3), %s288_s12, 3 }
  0x39   : > { %s2303_s0 = scalar_lea.vmem %s2847_s3, %s1655_s13 }
  0x3a   : > { %v303_v4 = vld [vmem:[%s2303_s0] sm:$0xff]  ;;  %v305_v5 = vld [vmem:[%s2303_s0 + $0x8] sm:$0xff] }
  0x3b   : > { %v307_v6 = vld [vmem:[%s2303_s0 + $0x20] sm:$0xff]  ;;  %304 = vst [vmem:[%s285_s30] sm:$0xff] %v303_v4  ;;  %306 = vst [vmem:[%s285_s30 + $0x8] sm:$0xff] %v305_v5  ;;  %v309_v7 = vld [vmem:[%s2303_s0 + $0x28] sm:$0xff] }
  0x3c   : > { %308 = vst [vmem:[%s285_s30 + $0x10] sm:$0xff] %v307_v6  ;;  %v311_v8 = vld [vmem:[%s2303_s0 + $0x40] sm:$0xff]  ;;  %v313_v9 = vld [vmem:[%s2303_s0 + $0x48] sm:$0xff]  ;;  %310 = vst [vmem:[%s285_s30 + $0x18] sm:$0xff] %v309_v7 }
  0x3d   : > { %312 = vst [vmem:[%s285_s30 + $0x20] sm:$0xff] %v311_v8  ;;  %314 = vst [vmem:[%s285_s30 + $0x28] sm:$0xff] %v313_v9  ;;  %v315_v10 = vld [vmem:[%s2303_s0 + $0x60] sm:$0xff]  ;;  %v317_v11 = vld [vmem:[%s2303_s0 + $0x68] sm:$0xff] }
  0x3e   : > { %v319_v12 = vld [vmem:[%s2303_s0 + $0x80] sm:$0xff]  ;;  %316 = vst [vmem:[%s285_s30 + $0x30] sm:$0xff] %v315_v10  ;;  %318 = vst [vmem:[%s285_s30 + $0x38] sm:$0xff] %v317_v11  ;;  %v321_v13 = vld [vmem:[%s2303_s0 + $0x88] sm:$0xff] }
  0x3f   : > { %320 = vst [vmem:[%s285_s30 + $0x40] sm:$0xff] %v319_v12  ;;  %v323_v14 = vld [vmem:[%s2303_s0 + $0xa0] sm:$0xff]  ;;  %v325_v15 = vld [vmem:[%s2303_s0 + $0xa8] sm:$0xff]  ;;  %322 = vst [vmem:[%s285_s30 + $0x48] sm:$0xff] %v321_v13 }
  0x40   : > { %324 = vst [vmem:[%s285_s30 + $0x50] sm:$0xff] %v323_v14  ;;  %326 = vst [vmem:[%s285_s30 + $0x58] sm:$0xff] %v325_v15  ;;  %v327_v16 = vld [vmem:[%s2303_s0 + $0xc0] sm:$0xff]  ;;  %v329_v17 = vld [vmem:[%s2303_s0 + $0xc8] sm:$0xff] }
  0x41   : > { %v331_v18 = vld [vmem:[%s2303_s0 + $0xe0] sm:$0xff]  ;;  %328 = vst [vmem:[%s285_s30 + $0x60] sm:$0xff] %v327_v16  ;;  %330 = vst [vmem:[%s285_s30 + $0x68] sm:$0xff] %v329_v17  ;;  %v333_v19 = vld [vmem:[%s2303_s0 + $0xe8] sm:$0xff] }
  0x42   : > { %332 = vst [vmem:[%s285_s30 + $0x70] sm:$0xff] %v331_v18  ;;  %334 = vst [vmem:[%s285_s30 + $0x78] sm:$0xff] %v333_v19 }
  0x43 PF: > { %p1656_p0 = scmp.ge.s32.totalorder %s2158_s27, 1  ;;  %p350_p1 = scmp.lt.s32.totalorder %s2158_s27, 5 }
  0x45   : > { %p351_p2 = pnand %p1656_p0, %p350_p1 }
  0x46   : > { %s357_s9 = sand.u32 (!%p351_p2), 1, %s2134_s21   ;;  %s2826_s7 = sand.u32 (!%p351_p2), 1, %s2126_s19  }
  0x47   : > { %354 = sbr.rel (%p351_p2) target bundleno = 899 (0x383), region = 78  ;;  %s1657_s17 = sshll.u32 (!%p351_p2), %s357_s9, 5 }
  0x48   : > { %s1658_s28 = sshll.u32 (!%p351_p2), %s357_s9, 7  ;;  %s1883_s0 = smul.u32 (!%p351_p2), 96, %s2826_s7 }
  0x49   : > { %p421_p3 = scmp.lt.s32.totalorder (!%p351_p2), %s2146_s24, 1  ;;  %s1661_s6 = sshll.u32 (!%p351_p2), %s2142_s23, 5 }
  0x4a   : > { %p432_p4 = scmp.lt.s32.totalorder (!%p351_p2), %s1661_s6, 63  ;;  %s359_s20 = scalar_lea.vmem (!%p351_p2), [#allocation5], %s1657_s17 }
  0x4b   : > { %s2343_s14 = scalar_lea.vmem (!%p351_p2), [#allocation6], %s1658_s28  ;;  %s2345_s18 = scalar_lea.vmem (!%p351_p2), [#allocation7], %s1883_s0 }
  0x4c   : > { %p1666_p5 = scmp.ne.s32.totalorder (!%p351_p2), %s2142_s23, 0 }
  0x4e   : > { %s422_s8 = scalar_select %p421_p3, %s2146_s24, 1 }
  0x4f   : > { %s2868_s6 = smov (!%p432_p4, %s1661_s6), 63  ;;  %451 = sbr.rel (%p1666_p5) target bundleno = 86 (0x56), region = 90 }
  0x50   : > { %s1703_s12 = sshll.u32 %s422_s8, 4  ;;  %s1662_s13 = sshll.u32 %s422_s8, 6  ;;  %v2160_v20 = vmov (!%p1666_p5), -inf   ;;  %v2161_v21 = vmov (!%p1666_p5), 0.0  }
  0x51   : > { %s428_s30 = scalar_lea.vmem %s2817_s1, %s1703_s12  ;;  %s435_s3 = sadd.s32 %s1662_s13, %s2868_s6  ;;  %452 = vst [vmem:[#allocation2] sm:$0x1] (!%p1666_p5), %v2160_v20  ;;  %453 = vst [vmem:[#allocation3] sm:$0x1] (!%p1666_p5), %v2161_v21 }
  0x52   : > { %s1663_s26 = sshll.u32 %s435_s3, 3  ;;  %s1704_s25 = sshll.u32 %s422_s8, 5  ;;  %454 = vst [vmem:[#allocation4] sm:$0xff] (!%p1666_p5), %v2161_v21  ;;  %455 = vst [vmem:[#allocation4 + $0x8] sm:$0xff] (!%p1666_p5), %v2161_v21 }
  0x53   : > { %s2336_s9 = scalar_lea.vmem %s2818_s2, %s1663_s26  ;;  %s2341_s15 = scalar_lea.vmem %s2820_s4, %s1704_s25  ;;  %456 = vst [vmem:[#allocation4 + $0x10] sm:$0xff] (!%p1666_p5), %v2161_v21  ;;  %457 = vst [vmem:[#allocation4 + $0x18] sm:$0xff] (!%p1666_p5), %v2161_v21 }
  0x54   : > { %458 = vst [vmem:[#allocation4 + $0x20] sm:$0xff] (!%p1666_p5), %v2161_v21  ;;  %459 = vst [vmem:[#allocation4 + $0x28] sm:$0xff] (!%p1666_p5), %v2161_v21 }
  0x55   : > { %460 = vst [vmem:[#allocation4 + $0x30] sm:$0xff] (!%p1666_p5), %v2161_v21  ;;  %461 = vst [vmem:[#allocation4 + $0x38] sm:$0xff] (!%p1666_p5), %v2161_v21 }
  0x56 PF: > { %v462_v22 = vld [vmem:[%s359_s20] sm:$0xff]  ;;  %v463_v23 = vld [vmem:[%s359_s20 + $0x8] sm:$0xff]  ;;  %v464_v26 = vld [vmem:[%s359_s20 + $0x10] sm:$0xff]  ;;  %v2162_v29 = vmov 0   ;;  %vm532_vm0 = vcmask 130048   ;;  %p1699_p6 = scmp.ne.s32.totalorder %s2142_s23, 1 }
  0x57   : > { %466 = vxpose.xlu0.b32.start [1/2] (short) %v462_v22, 128  ;;  %498 = vxpose.xlu1.b32.start [1/2] (short) %v463_v23, 128  ;;  %v530_v24 = vld [vmem:[%s428_s30] sm:$0xff]  ;;  %v531_v25 = vld [vmem:[%s428_s30 + $0x8] sm:$0xff]  ;;  %v856_v31 = vld [vmem:[%s2336_s9 + $0x10] sm:$0xff] }
  0x58   : > { %v465_v27 = vld [vmem:[%s359_s20 + $0x18] sm:$0xff]  ;;  %v1847_v28 = vpack.c.bf16 %v531_v25, %v530_v24  ;;  %v855_v30 = vld [vmem:[%s2336_s9 + $0x8] sm:$0xff]  ;;  %v860_v36 = vld [vmem:[%s2336_s9 + $0x30] sm:$0xff] }
  0x59   : > { %v857_v32 = vld [vmem:[%s2336_s9 + $0x18] sm:$0xff]  ;;  %v854_v33 = vld [vmem:[%s2336_s9] sm:$0xff]  ;;  %v859_v35 = vld [vmem:[%s2336_s9 + $0x28] sm:$0xff] }
  0x5a   : > { %1848 = vmatprep.subr.bf16.mxu0 %v1847_v28  ;;  %v858_v34 = vld [vmem:[%s2336_s9 + $0x20] sm:$0xff]  ;;  %v861_v37 = vld [vmem:[%s2336_s9 + $0x38] sm:$0xff]  ;;  %v863_v39 = vld [vmem:[%s2336_s9 + $0x48] sm:$0xff] }
  0x5b   : > { %467 = vxpose.xlu0.b32.end [2/2] (short) %v464_v26, 128  ;;  %499 = vxpose.xlu1.b32.end [2/2] (short) %v465_v27, 128  ;;  %v862_v38 = vld [vmem:[%s2336_s9 + $0x40] sm:$0xff]  ;;  %v864_v40 = vld [vmem:[%s2336_s9 + $0x50] sm:$0xff]  ;;  %v865_v41 = vld [vmem:[%s2336_s9 + $0x58] sm:$0xff] }
  0x5c   : > { %1850 = vmatpush3.bf16.msra.mxu0 %v1847_v28  ;;  %v866_v42 = vld [vmem:[%s2336_s9 + $0x60] sm:$0xff]  ;;  %v867_v43 = vld [vmem:[%s2336_s9 + $0x68] sm:$0xff]  ;;  %v868_v44 = vld [vmem:[%s2336_s9 + $0x70] sm:$0xff] }
  0x5d   : > { %v869_v45 = vld [vmem:[%s2336_s9 + $0x78] sm:$0xff]  ;;  %v870_v46 = vld [vmem:[%s2336_s9 + $0x80] sm:$0xff]  ;;  %v871_v47 = vld [vmem:[%s2336_s9 + $0x88] sm:$0xff] }
  0x5e   : > { %v872_v48 = vld [vmem:[%s2336_s9 + $0x90] sm:$0xff]  ;;  %v873_v51 = vld [vmem:[%s2336_s9 + $0x98] sm:$0xff]  ;;  %v874_v52 = vld [vmem:[%s2336_s9 + $0xa0] sm:$0xff] }
  0x5f   : > { %v875_v55 = vld [vmem:[%s2336_s9 + $0xa8] sm:$0xff]  ;;  %v876_v56 = vld [vmem:[%s2336_s9 + $0xb0] sm:$0xff]  ;;  %v877_v58 = vld [vmem:[%s2336_s9 + $0xb8] sm:$0xff] }
  0x60   : > { %v878_v59 = vld [vmem:[%s2336_s9 + $0xc0] sm:$0xff]  ;;  %v879_v62 = vld [vmem:[%s2336_s9 + $0xc8] sm:$0xff]  ;;  %v880_v63 = vld [vmem:[%s2336_s9 + $0xd0] sm:$0xff] }
  0x61   : > { %v881_v2 = vld [vmem:[%s2336_s9 + $0xd8] sm:$0xff]  ;;  %v882_v3 = vld [vmem:[%s2336_s9 + $0xe0] sm:$0xff]  ;;  %v883_v5 = vld [vmem:[%s2336_s9 + $0xe8] sm:$0xff] }
  0x62   : > { %v884_v6 = vld [vmem:[%s2336_s9 + $0xf0] sm:$0xff]  ;;  %v885_v9 = vld [vmem:[%s2336_s9 + $0xf8] sm:$0xff] }
  0x79   : > { %1979 = vset.pattern.permute.xlu1 %v2162_v29 }
  0x84   : > { %1978 = vset.pattern.permute.xlu0 %v2162_v29 }
  0xb1   : > { %893 = vperm.xlu1 %1979, %v855_v30  }
  0xb5   : > { %898 = vperm.xlu1 %1979, %v856_v31  }
  0xb9   : > { %903 = vperm.xlu1 %1979, %v857_v32  }
  0xbc   : > { %888 = vperm.xlu0 %1978, %v854_v33  }
  0xbd   : > { %908 = vperm.xlu1 %1979, %v858_v34  }
  0xc0   : > { %913 = vperm.xlu0 %1978, %v859_v35  }
  0xc1   : > { %918 = vperm.xlu1 %1979, %v860_v36  }
  0xc4   : > { %923 = vperm.xlu0 %1978, %v861_v37  }
  0xc5   : > { %928 = vperm.xlu1 %1979, %v862_v38  }
  0xc8   : > { %933 = vperm.xlu0 %1978, %v863_v39  }
  0xc9   : > { %938 = vperm.xlu1 %1979, %v864_v40  }
  0xcc   : > { %943 = vperm.xlu0 %1978, %v865_v41  }
  0xcd   : > { %948 = vperm.xlu1 %1979, %v866_v42  }
  0xd0   : > { %953 = vperm.xlu0 %1978, %v867_v43  }
  0xd1   : > { %958 = vperm.xlu1 %1979, %v868_v44  }
  0xd4   : > { %963 = vperm.xlu0 %1978, %v869_v45  }
  0xd5   : > { %968 = vperm.xlu1 %1979, %v870_v46  }
  0xd7   : > { %v482_v49 = vpop.trf.xlu0  ;;  %v2367_v50 = vpop.trf.xlu1 }
  0xd8   : > { %1799 = vmatprep.mubr.msk.f32.mxu0 %vm532_vm0, %v482_v49  ;;  %973 = vperm.xlu0 %1978, %v871_v47  }
  0xd9   : > { %978 = vperm.xlu1 %1979, %v872_v48  }
  0xdb   : > { %v483_v53 = vpop.trf.xlu0  ;;  %v515_v54 = vpop.trf.xlu1 }
  0xdc   : > { %1800 = vmatmul.mubr.msk.f32.vlgmr.msra.gmra.mrb[0].mxu0 %vm532_vm0, %v483_v53  ;;  %983 = vperm.xlu0 %1978, %v873_v51  }
  0xdd   : > { %988 = vperm.xlu1 %1979, %v874_v52  }
  0xdf   : > { %v484_v57 = vpop.trf.xlu0  ;;  %v516_v61 = vpop.trf.xlu1 }
  0xe0   : > { %1802 = vmatprep.mubr.msk.f32.mxu0 %vm532_vm0, %v484_v57  ;;  %993 = vperm.xlu0 %1978, %v875_v55  }
  0xe1   : > { %998 = vperm.xlu1 %1979, %v876_v56  }
  0xe3   : > { %v485_v60 = vpop.trf.xlu0  ;;  %v517_v1 = vpop.trf.xlu1 }
  0xe4   : > { %1803 = vmatmul.mubr.msk.f32.gmra.mrb[2].mxu0 %vm532_vm0, %v485_v60  ;;  %1003 = vperm.xlu0 %1978, %v877_v58  }
  0xe5   : > { %1008 = vperm.xlu1 %1979, %v878_v59  }
  0xe7   : > { %v486_v0 = vpop.trf.xlu0  ;;  %v518_v8 = vpop.trf.xlu1 }
  0xe8   : > { %1805 = vmatprep.mubr.msk.f32.mxu0 %vm532_vm0, %v486_v0  ;;  %1013 = vperm.xlu0 %1978, %v879_v62  }
  0xe9   : > { %1018 = vperm.xlu1 %1979, %v880_v63  }
  0xeb   : > { %v487_v4 = vpop.trf.xlu0  ;;  %v519_v11 = vpop.trf.xlu1 }
  0xec   : > { %1806 = vmatmul.mubr.msk.f32.gmra.mrb[4].mxu0 %vm532_vm0, %v487_v4  ;;  %1023 = vperm.xlu0 %1978, %v881_v2  }
  0xed   : > { %1028 = vperm.xlu1 %1979, %v882_v3  }
  0xef   : > { %v488_v7 = vpop.trf.xlu0  ;;  %v520_v14 = vpop.trf.xlu1 }
  0xf0   : > { %1808 = vmatprep.mubr.msk.f32.mxu0 %vm532_vm0, %v488_v7  ;;  %1033 = vperm.xlu0 %1978, %v883_v5  }
  0xf1   : > { %1038 = vperm.xlu1 %1979, %v884_v6  }
  0xf3   : > { %v489_v10 = vpop.trf.xlu0  ;;  %v521_v16 = vpop.trf.xlu1 }
  0xf4   : > { %1809 = vmatmul.mubr.msk.f32.gmra.mrb[6].mxu0 %vm532_vm0, %v489_v10  ;;  %1043 = vperm.xlu0 %1978, %v885_v9  }
  0xf7   : > { %v490_v12 = vpop.trf.xlu0  ;;  %v522_v19 = vpop.trf.xlu1 }
  0xf8   : > { %1811 = vmatprep.mubr.msk.f32.mxu0 %vm532_vm0, %v490_v12 }
  0xfb   : > { %v491_v13 = vpop.trf.xlu0  ;;  %v523_v21 = vpop.trf.xlu1 }
  0xfc   : > { %1812 = vmatmul.mubr.msk.f32.gmra.mrb[8].mxu0 %vm532_vm0, %v491_v13 }
  0xff   : > { %v492_v15 = vpop.trf.xlu0  ;;  %v524_v24 = vpop.trf.xlu1 }
 0x100   : > { %1814 = vmatprep.mubr.msk.f32.mxu0 %vm532_vm0, %v492_v15 }
 0x103   : > { %v493_v17 = vpop.trf.xlu0  ;;  %v525_v25 = vpop.trf.xlu1 }
 0x104   : > { %1815 = vmatmul.mubr.msk.f32.gmra.mrb[10].mxu0 %vm532_vm0, %v493_v17 }
 0x107   : > { %v494_v18 = vpop.trf.xlu0  ;;  %v526_v26 = vpop.trf.xlu1 }
 0x108   : > { %1817 = vmatprep.mubr.msk.f32.mxu0 %vm532_vm0, %v494_v18 }
 0x10b   : > { %v495_v20 = vpop.trf.xlu0  ;;  %v527_v27 = vpop.trf.xlu1 }
 0x10c   : > { %1818 = vmatmul.mubr.msk.f32.gmra.mrb[12].mxu0 %vm532_vm0, %v495_v20 }
 0x10f   : > { %v496_v22 = vpop.trf.xlu0  ;;  %v528_v28 = vpop.trf.xlu1 }
 0x110   : > { %1820 = vmatprep.mubr.msk.f32.mxu0 %vm532_vm0, %v496_v22 }
 0x113   : > { %v497_v23 = vpop.trf.xlu0  ;;  %v529_v29 = vpop.trf.xlu1 }
 0x114   : > { %1821 = vmatmul.mubr.msk.f32.gmra.mrb[14].mxu0 %vm532_vm0, %v497_v23 }
 0x115   : > { %1823 = vmatprep.mubr.msk.f32.mxu0 %vm532_vm0, %v2367_v50 }
 0x118   : > { %1824 = vmatmul.mubr.msk.f32.gmra.mrb[16].mxu0 %vm532_vm0, %v515_v54 }
 0x119   : > { %1826 = vmatprep.mubr.msk.f32.mxu0 %vm532_vm0, %v516_v61 }
 0x11c   : > { %1827 = vmatmul.mubr.msk.f32.gmra.mrb[18].mxu0 %vm532_vm0, %v517_v1 }
 0x11d   : > { %1829 = vmatprep.mubr.msk.f32.mxu0 %vm532_vm0, %v518_v8 }
 0x120   : > { %1830 = vmatmul.mubr.msk.f32.gmra.mrb[20].mxu0 %vm532_vm0, %v519_v11 }
 0x121   : > { %1832 = vmatprep.mubr.msk.f32.mxu0 %vm532_vm0, %v520_v14 }
 0x124   : > { %1833 = vmatmul.mubr.msk.f32.gmra.mrb[22].mxu0 %vm532_vm0, %v521_v16 }
 0x125   : > { %1835 = vmatprep.mubr.msk.f32.mxu0 %vm532_vm0, %v522_v19 }
 0x128   : > { %1836 = vmatmul.mubr.msk.f32.gmra.mrb[24].mxu0 %vm532_vm0, %v523_v21 }
 0x129   : > { %1838 = vmatprep.mubr.msk.f32.mxu0 %vm532_vm0, %v524_v24 }
 0x12c   : > { %1839 = vmatmul.mubr.msk.f32.gmra.mrb[26].mxu0 %vm532_vm0, %v525_v25 }
 0x12d   : > { %1841 = vmatprep.mubr.msk.f32.mxu0 %vm532_vm0, %v526_v26 }
 0x130   : > { %1842 = vmatmul.mubr.msk.f32.gmra.mrb[28].mxu0 %vm532_vm0, %v527_v27  ;;  %v894_v30 = vpop.permute.xlu1 %893 }
 0x131   : > { %1844 = vmatprep.mubr.msk.f32.mxu0 %vm532_vm0, %v528_v28 }
 0x134   : > { %1845 = vmatmul.mubr.msk.f32.gmra.mrb[30].mxu0 %vm532_vm0, %v529_v29  ;;  %v899_v31 = vpop.permute.xlu1 %898 }
 0x138   : > { %v904_v35 = vpop.permute.xlu1 %903 }
 0x13b   : > { %v889_v34 = vpop.permute.xlu0 %888 }
 0x13c   : > { %v909_v39 = vpop.permute.xlu1 %908 }
 0x13f   : > { %v914_v38 = vpop.permute.xlu0 %913 }
 0x140   : > { %v919_v42 = vpop.permute.xlu1 %918 }
 0x143   : > { %v924_v40 = vpop.permute.xlu0 %923 }
 0x144   : > { %v929_v51 = vpop.permute.xlu1 %928 }
 0x147   : > { %v934_v50 = vpop.permute.xlu0 %933 }
 0x148   : > { %v939_v61 = vpop.permute.xlu1 %938 }
 0x14b   : > { %v944_v59 = vpop.permute.xlu0 %943 }
 0x14c   : > { %v949_v3 = vpop.permute.xlu1 %948 }
 0x14f   : > { %v954_v1 = vpop.permute.xlu0 %953 }
 0x150   : > { %v959_v8 = vpop.permute.xlu1 %958 }
 0x153   : > { %v964_v6 = vpop.permute.xlu0 %963 }
 0x154   : > { %v969_v15 = vpop.permute.xlu1 %968 }
 0x157   : > { %v974_v14 = vpop.permute.xlu0 %973 }
 0x158   : > { %v979_v23 = vpop.permute.xlu1 %978 }
 0x15b   : > { %v984_v21 = vpop.permute.xlu0 %983 }
 0x15c   : > { %v989_v29 = vpop.permute.xlu1 %988 }
 0x15f   : > { %v994_v27 = vpop.permute.xlu0 %993 }
 0x1af   : > { %v1801_v32 = vpop.f32.mrb[0].mxu0 }
 0x1b0   : > { %v695_v33 = vpop.f32.mrb[1].mxu0  ;;  %v2415_v43 = vsub.f32 %v1801_v32, %v894_v30 }
 0x1b1   : > { %v2419_v46 = vsub.f32 %v695_v33, %v889_v34 }
 0x1b7   : > { %v1804_v36 = vpop.f32.mrb[2].mxu0 }
 0x1b8   : > { %v705_v37 = vpop.f32.mrb[3].mxu0  ;;  %v2427_v53 = vsub.f32 %v1804_v36, %v904_v35 }
 0x1b9   : > { %v2431_v56 = vsub.f32 %v705_v37, %v899_v31  ;;  %v1004_v37 = vpop.permute.xlu0 %1003 }
 0x1bf   : > { %v1807_v41 = vpop.f32.mrb[4].mxu0 }
 0x1c0   : > { %v2417_v44 = vsub.f32 %v1807_v41, %v914_v38  ;;  %v715_v45 = vpop.f32.mrb[5].mxu0 }
 0x1c1   : > { %v2421_v47 = vsub.f32 %v715_v45, %v909_v39 }
 0x1c2   : > { %v1080_v48 = vmax.f32 %v2415_v43, %v2417_v44 }
 0x1c3   : > { %v1079_v49 = vmax.f32 %v2419_v46, %v2421_v47 }
 0x1c7   : > { %v1810_v52 = vpop.f32.mrb[6].mxu0 }
 0x1c8   : > { %v2429_v54 = vsub.f32 %v1810_v52, %v924_v40  ;;  %v725_v55 = vpop.f32.mrb[7].mxu0  ;;  %v999_v40 = vpop.permute.xlu1 %998 }
 0x1c9   : > { %v2433_v57 = vsub.f32 %v725_v55, %v919_v42  ;;  %v1014_v55 = vpop.permute.xlu0 %1013 }
 0x1ca   : > { %v1082_v58 = vmax.f32 %v2427_v53, %v2429_v54 }
 0x1cb   : > { %v1081_v60 = vmax.f32 %v2431_v56, %v2433_v57 }
 0x1cf   : > { %v1813_v62 = vpop.f32.mrb[8].mxu0 }
 0x1d0   : > { %v2439_v63 = vsub.f32 %v1813_v62, %v934_v50  ;;  %v735_v0 = vpop.f32.mrb[9].mxu0 }
 0x1d1   : > { %v2441_v2 = vsub.f32 %v735_v0, %v929_v51 }
 0x1d2   : > { %v1084_v4 = vmax.f32 %v1080_v48, %v2439_v63 }
 0x1d3   : > { %v1083_v5 = vmax.f32 %v1079_v49, %v2441_v2 }
 0x1d7   : > { %v1816_v7 = vpop.f32.mrb[10].mxu0 }
 0x1d8   : > { %v2445_v9 = vsub.f32 %v1816_v7, %v944_v59  ;;  %v745_v10 = vpop.f32.mrb[11].mxu0  ;;  %v1286_v59 = vld [vmem:[%s2343_s14 + $0x8] sm:$0xff] }
 0x1d9   : > { %v2447_v11 = vsub.f32 %v745_v10, %v939_v61  ;;  %1365 = vmatprep.mubr.f32.mxu1 %v1286_v59 }
 0x1da   : > { %v1086_v12 = vmax.f32 %v1082_v58, %v2445_v9 }
 0x1db   : > { %v1085_v13 = vmax.f32 %v1081_v60, %v2447_v11  ;;  %v1009_v60 = vpop.permute.xlu1 %1008 }
 0x1df   : > { %v1819_v16 = vpop.f32.mrb[12].mxu0  ;;  %v1019_v10 = vpop.permute.xlu1 %1018 }
 0x1e0   : > { %v2451_v17 = vsub.f32 %v1819_v16, %v954_v1  ;;  %v755_v18 = vpop.f32.mrb[13].mxu0 }
 0x1e1   : > { %v2453_v19 = vsub.f32 %v755_v18, %v949_v3 }
 0x1e2   : > { %v1088_v20 = vmax.f32 %v1084_v4, %v2451_v17 }
 0x1e3   : > { %v1087_v22 = vmax.f32 %v1083_v5, %v2453_v19 }
 0x1e7   : > { %v1822_v24 = vpop.f32.mrb[14].mxu0 }
 0x1e8   : > { %v2457_v25 = vsub.f32 %v1822_v24, %v964_v6  ;;  %v765_v26 = vpop.f32.mrb[15].mxu0  ;;  %v1024_v6 = vpop.permute.xlu0 %1023 }
 0x1e9   : > { %v2459_v28 = vsub.f32 %v765_v26, %v959_v8  ;;  %v1029_v24 = vpop.permute.xlu1 %1028 }
 0x1ea   : > { %v1090_v30 = vmax.f32 %v1086_v12, %v2457_v25 }
 0x1eb   : > { %v1089_v31 = vmax.f32 %v1085_v13, %v2459_v28  ;;  %v1825_v32 = vpop.f32.mrb[16].mxu0 }
 0x1ec   : > { %v2463_v33 = vsub.f32 %v1825_v32, %v974_v14  ;;  %v775_v34 = vpop.f32.mrb[17].mxu0 }
 0x1ed   : > { %v2465_v35 = vsub.f32 %v775_v34, %v969_v15 }
 0x1ee   : > { %v1092_v36 = vmax.f32 %v1088_v20, %v2463_v33 }
 0x1ef   : > { %v1091_v38 = vmax.f32 %v1087_v22, %v2465_v35  ;;  %v1828_v39 = vpop.f32.mrb[18].mxu0  ;;  %v1034_v22 = vpop.permute.xlu0 %1033 }
 0x1f0   : > { %v2469_v41 = vsub.f32 %v1828_v39, %v984_v21  ;;  %v785_v42 = vpop.f32.mrb[19].mxu0  ;;  %v1039_v39 = vpop.permute.xlu1 %1038 }
 0x1f1   : > { %v2471_v45 = vsub.f32 %v785_v42, %v979_v23 }
 0x1f2   : > { %v1094_v48 = vmax.f32 %v1090_v30, %v2469_v41 }
 0x1f3   : > { %v1093_v49 = vmax.f32 %v1089_v31, %v2471_v45  ;;  %v1831_v50 = vpop.f32.mrb[20].mxu0 }
 0x1f4   : > { %v2475_v51 = vsub.f32 %v1831_v50, %v994_v27  ;;  %v795_v52 = vpop.f32.mrb[21].mxu0 }
 0x1f5   : > { %v2477_v58 = vsub.f32 %v795_v52, %v989_v29 }
 0x1f6   : > { %v1096_v61 = vmax.f32 %v1092_v36, %v2475_v51  ;;  %v1044_v36 = vpop.permute.xlu0 %1043 }
 0x1f7   : > { %v1095_v62 = vmax.f32 %v1091_v38, %v2477_v58  ;;  %v1834_v0 = vpop.f32.mrb[22].mxu0 }
 0x1f8   : > { %v2482_v1 = vsub.f32 %v1834_v0, %v1004_v37  ;;  %v805_v3 = vpop.f32.mrb[23].mxu0 }
 0x1f9   : > { %v2484_v4 = vsub.f32 %v805_v3, %v999_v40 }
 0x1fa   : > { %v1098_v5 = vmax.f32 %v1094_v48, %v2482_v1 }
 0x1fb   : > { %v1097_v7 = vmax.f32 %v1093_v49, %v2484_v4  ;;  %v1837_v8 = vpop.f32.mrb[24].mxu0 }
 0x1fc   : > { %v2488_v12 = vsub.f32 %v1837_v8, %v1014_v55  ;;  %v815_v13 = vpop.f32.mrb[25].mxu0 }
 0x1fd   : > { %v2490_v14 = vsub.f32 %v815_v13, %v1009_v60 }
 0x1fe   : > { %v1100_v15 = vmax.f32 %v1096_v61, %v2488_v12 }
 0x1ff   : > { %v1099_v16 = vmax.f32 %v1095_v62, %v2490_v14  ;;  %v1840_v18 = vpop.f32.mrb[26].mxu0  ;;  %v1121_v62 = vlaneseq }
 0x200   : > { %v2494_v20 = vsub.f32 %v1840_v18, %v1024_v6  ;;  %v825_v21 = vpop.f32.mrb[27].mxu0 }
 0x201   : > { %v2496_v23 = vsub.f32 %v825_v21, %v1019_v10 }
 0x202   : > { %v1102_v26 = vmax.f32 %v1098_v5, %v2494_v20  ;;  %v1122_v5 = vshrl.u32 %v1121_v62, 7 }
 0x203   : > { %v1101_v27 = vmax.f32 %v1097_v7, %v2496_v23  ;;  %v1843_v29 = vpop.f32.mrb[28].mxu0  ;;  %v1078_v7 = vld [vmem:[#allocation2] sm:$0x1] }
 0x204   : > { %v2500_v30 = vsub.f32 %v1843_v29, %v1034_v22  ;;  %v835_v31 = vpop.f32.mrb[29].mxu0  ;;  %v2512_v10 = vsub.s32 0, %v1122_v5 }
 0x205   : > { %v2502_v32 = vsub.f32 %v835_v31, %v1029_v24 }
 0x206   : > { %v1104_v34 = vmax.f32 %v1100_v15, %v2500_v30 }
 0x207   : > { %v1103_v37 = vmax.f32 %v1099_v16, %v2502_v32  ;;  %v1846_v38 = vpop.f32.mrb[30].mxu0 }
 0x208   : > { %v2506_v40 = vsub.f32 %v1846_v38, %v1044_v36  ;;  %v845_v42 = vpop.f32.mrb[31].mxu0 }
 0x209   : > { %v1107_v48 = vmax.f32 %v1103_v37, %v1104_v34  ;;  %v2508_v49 = vsub.f32 %v845_v42, %v1039_v39 }
 0x20a   : > { %v1106_v50 = vmax.f32 %v1102_v26, %v2506_v40 }
 0x20b   : > { %v1105_v52 = vmax.f32 %v1101_v27, %v2508_v49 }
 0x20d   : > { %v1108_v55 = vmax.f32 %v1105_v52, %v1106_v50 }
 0x20f   : > { %v1109_v59 = vmax.f32 %v1107_v48, %v1108_v55 }
 0x211   : > { %v1110_v60 = vrot.slane %v1109_v59, 4 }
 0x213   : > { %v1111_v61 = vmax.f32 %v1109_v59, %v1110_v60 }
 0x215   : > { %v1112_v0 = vrot.slane %v1111_v61, 2 }
 0x217   : > { %v1113_v3 = vmax.f32 %v1111_v61, %v1112_v0 }
 0x219   : > { %v1114_v6 = vrot.slane %v1113_v3, 1 }
 0x21b   : > { %v1115_v8 = vmax.f32 %v1113_v3, %v1114_v6 }
 0x21d   : > { %v1116_v13 = vmax.f32 %v1078_v7, %v1115_v8 }
 0x21f   : > { %v1117_v15 = vsub.f32 %v1078_v7, %v1116_v13  ;;  %v2515_v16 = vrot.slane %v1116_v13, %v2512_v10  ;;  %1422 = vst [vmem:[#allocation2] sm:$0x1] %v1116_v13 }
 0x221   : > { %v1118_v18 = vmul.f32 1.442695, %v1117_v15  ;;  %v1126_v21 = vsub.f32 %v2419_v46, %v2515_v16  ;;  %v1127_v22 = vsub.f32 %v2415_v43, %v2515_v16  ;;  %v1128_v24 = vsub.f32 %v2431_v56, %v2515_v16 }
 0x222   : > { %v1129_v26 = vsub.f32 %v2427_v53, %v2515_v16  ;;  %v1130_v27 = vsub.f32 %v2421_v47, %v2515_v16  ;;  %v1131_v29 = vsub.f32 %v2417_v44, %v2515_v16  ;;  %v1132_v31 = vsub.f32 %v2433_v57, %v2515_v16 }
 0x223   : > { %1980 = vpow2.f32 %v1118_v18  ;;  %v1133_v46 = vsub.f32 %v2429_v54, %v2515_v16  ;;  %v1134_v43 = vsub.f32 %v2441_v2, %v2515_v16  ;;  %v1135_v56 = vsub.f32 %v2439_v63, %v2515_v16 }
 0x224   : > { %v1136_v53 = vsub.f32 %v2447_v11, %v2515_v16  ;;  %v1137_v47 = vsub.f32 %v2445_v9, %v2515_v16  ;;  %v1138_v44 = vsub.f32 %v2453_v19, %v2515_v16  ;;  %v1139_v57 = vsub.f32 %v2451_v17, %v2515_v16 }
 0x225   : > { %v1140_v54 = vsub.f32 %v2459_v28, %v2515_v16  ;;  %v1141_v2 = vsub.f32 %v2457_v25, %v2515_v16  ;;  %v1142_v63 = vsub.f32 %v2465_v35, %v2515_v16  ;;  %v1143_v11 = vsub.f32 %v2463_v33, %v2515_v16 }
 0x226   : > { %v1144_v9 = vsub.f32 %v2471_v45, %v2515_v16  ;;  %v1145_v19 = vsub.f32 %v2469_v41, %v2515_v16  ;;  %v1146_v17 = vsub.f32 %v2477_v58, %v2515_v16  ;;  %v1147_v28 = vsub.f32 %v2475_v51, %v2515_v16 }
 0x227   : > { %v1148_v25 = vsub.f32 %v2484_v4, %v2515_v16  ;;  %v1149_v35 = vsub.f32 %v2482_v1, %v2515_v16  ;;  %v1150_v33 = vsub.f32 %v2490_v14, %v2515_v16  ;;  %v1151_v45 = vsub.f32 %v2488_v12, %v2515_v16 }
 0x228   : > { %v1152_v41 = vsub.f32 %v2496_v23, %v2515_v16  ;;  %v1153_v58 = vsub.f32 %v2494_v20, %v2515_v16  ;;  %v1154_v34 = vsub.f32 %v2502_v32, %v2515_v16  ;;  %v1155_v36 = vsub.f32 %v2500_v30, %v2515_v16 }
 0x229   : > { %v1156_v37 = vsub.f32 %v2508_v49, %v2515_v16  ;;  %v1157_v38 = vsub.f32 %v2506_v40, %v2515_v16  ;;  %v1158_v39 = vmul.f32 1.442695, %v1126_v21  ;;  %v1160_v42 = vmul.f32 1.442695, %v1127_v22 }
 0x22a   : > { %v1162_v48 = vmul.f32 1.442695, %v1128_v24  ;;  %v1164_v50 = vmul.f32 1.442695, %v1129_v26  ;;  %v1166_v52 = vmul.f32 1.442695, %v1130_v27 }
 0x22b   : > { %1982 = vpow2.f32 %v1158_v39  ;;  %v1168_v55 = vmul.f32 1.442695, %v1131_v29  ;;  %v1170_v60 = vmul.f32 1.442695, %v1132_v31  ;;  %v1172_v61 = vmul.f32 1.442695, %v1133_v46 }
 0x22c   : > { %1984 = vpow2.f32 %v1160_v42  ;;  %v1174_v62 = vmul.f32 1.442695, %v1134_v43  ;;  %v1176_v0 = vmul.f32 1.442695, %v1135_v56  ;;  %v1178_v3 = vmul.f32 1.442695, %v1136_v53 }
 0x22d   : > { %v2581_v59 = vpop.eup %1980  ;;  %1986 = vpow2.f32 %v1162_v48  ;;  %v1180_v5 = vmul.f32 1.442695, %v1137_v47  ;;  %v1182_v6 = vmul.f32 1.442695, %v1138_v44  ;;  %v1184_v7 = vmul.f32 1.442695, %v1139_v57 }
 0x22e   : > { %1988 = vpow2.f32 %v1164_v50  ;;  %v2585_v8 = vrot.slane %v2581_v59, %v2512_v10  ;;  %v1186_v15 = vmul.f32 1.442695, %v1140_v54  ;;  %v1188_v21 = vmul.f32 1.442695, %v1141_v2 }
 0x22f   : > { %1990 = vpow2.f32 %v1166_v52  ;;  %v1190_v24 = vmul.f32 1.442695, %v1142_v63  ;;  %v1192_v31 = vmul.f32 1.442695, %v1143_v11  ;;  %v1194_v43 = vmul.f32 1.442695, %v1144_v9 }
 0x230   : > { %1992 = vpow2.f32 %v1168_v55  ;;  %v1196_v44 = vmul.f32 1.442695, %v1145_v19  ;;  %v1198_v54 = vmul.f32 1.442695, %v1146_v17  ;;  %v1200_v9 = vmul.f32 1.442695, %v1147_v28 }
 0x231   : > { %1994 = vpow2.f32 %v1170_v60  ;;  %v1202_v19 = vmul.f32 1.442695, %v1148_v25  ;;  %v1204_v51 = vmul.f32 1.442695, %v1149_v35  ;;  %v1206_v4 = vmul.f32 1.442695, %v1150_v33 }
 0x232   : > { %1996 = vpow2.f32 %v1172_v61  ;;  %v1208_v1 = vmul.f32 1.442695, %v1151_v45  ;;  %v1210_v14 = vmul.f32 1.442695, %v1152_v41  ;;  %v1212_v12 = vmul.f32 1.442695, %v1153_v58 }
 0x233   : > { %1998 = vpow2.f32 %v1174_v62  ;;  %v1214_v23 = vmul.f32 1.442695, %v1154_v34  ;;  %v1216_v20 = vmul.f32 1.442695, %v1155_v36 }
 0x234   : > { %2000 = vpow2.f32 %v1176_v0  ;;  %v1218_v0 = vmul.f32 1.442695, %v1156_v37 }
 0x235   : > { %v2587_v13 = vpop.eup %1982  ;;  %2002 = vpow2.f32 %v1178_v3 }
 0x236   : > { %v2589_v18 = vpop.eup %1984  ;;  %2004 = vpow2.f32 %v1180_v5  ;;  %v1220_v5 = vmul.f32 1.442695, %v1157_v38 }
 0x237   : > { %v2591_v22 = vpop.eup %1986  ;;  %2006 = vpow2.f32 %v1182_v6  ;;  %v1224_v26 = vadd.f32 %v2589_v18, %v2587_v13  ;;  %v1853_v27 = vpack.c.bf16 %v2589_v18, %v2587_v13 }
 0x238   : > { %v2597_v29 = vpop.eup %1988  ;;  %2008 = vpow2.f32 %v1184_v7 }
 0x239   : > { %v2599_v46 = vpop.eup %1990  ;;  %2010 = vpow2.f32 %v1186_v15  ;;  %v1225_v56 = vadd.f32 %v2591_v22, %v1224_v26  ;;  %v1857_v53 = vpack.c.bf16 %v2597_v29, %v2591_v22 }
 0x23a   : > { %v2604_v47 = vpop.eup %1992  ;;  %2012 = vpow2.f32 %v1188_v21 }
 0x23b   : > { %v2606_v57 = vpop.eup %1994  ;;  %2014 = vpow2.f32 %v1190_v24  ;;  %v1226_v2 = vadd.f32 %v2597_v29, %v1225_v56  ;;  %v1861_v63 = vpack.c.bf16 %v2604_v47, %v2599_v46 }
 0x23c   : > { %v2611_v11 = vpop.eup %1996  ;;  %2016 = vpow2.f32 %v1192_v31 }
 0x23d   : > { %v2616_v39 = vpop.eup %1998  ;;  %2018 = vpow2.f32 %v1194_v43  ;;  %v1227_v17 = vadd.f32 %v2599_v46, %v1226_v2  ;;  %v1865_v42 = vpack.c.bf16 %v2611_v11, %v2606_v57 }
 0x23e   : > { %v2624_v48 = vpop.eup %2000  ;;  %2020 = vpow2.f32 %v1196_v44 }
 0x23f   : > { %v2629_v28 = vpop.eup %2002  ;;  %2022 = vpow2.f32 %v1198_v54  ;;  %v1228_v25 = vadd.f32 %v2604_v47, %v1227_v17  ;;  %v1869_v50 = vpack.c.bf16 %v2624_v48, %v2616_v39 }
 0x240   : > { %v2637_v52 = vpop.eup %2004  ;;  %2024 = vpow2.f32 %v1200_v9 }
 0x241   : > { %v2642_v35 = vpop.eup %2006  ;;  %2026 = vpow2.f32 %v1202_v19  ;;  %v1229_v33 = vadd.f32 %v2606_v57, %v1228_v25  ;;  %v1873_v55 = vpack.c.bf16 %v2637_v52, %v2629_v28 }
 0x242   : > { %v2650_v60 = vpop.eup %2008  ;;  %2028 = vpow2.f32 %v1204_v51 }
 0x243   : > { %v2655_v45 = vpop.eup %2010  ;;  %2030 = vpow2.f32 %v1206_v4  ;;  %v1230_v41 = vadd.f32 %v2611_v11, %v1229_v33  ;;  %v1877_v61 = vpack.c.bf16 %v2650_v60, %v2642_v35  ;;  %v1290_v33 = vld [vmem:[%s2343_s14 + $0x28] sm:$0xff] }
 0x244   : > { %v2663_v62 = vpop.eup %2012  ;;  %2032 = vpow2.f32 %v1208_v1 }
 0x245   : > { %v2015_v58 = vpop.eup %2014  ;;  %2034 = vpow2.f32 %v1210_v14  ;;  %v1231_v32 = vadd.f32 %v2616_v39, %v1230_v41  ;;  %v1881_v34 = vpack.c.bf16 %v2663_v62, %v2655_v45 }
 0x246   : > { %v2017_v3 = vpop.eup %2016  ;;  %2036 = vpow2.f32 %v1212_v12  ;;  %v1292_v12 = vld [vmem:[%s2343_s14 + $0x38] sm:$0xff] }
 0x247   : > { %v2019_v6 = vpop.eup %2018  ;;  %2038 = vpow2.f32 %v1214_v23  ;;  %v1232_v30 = vadd.f32 %v2624_v48, %v1231_v32  ;;  %v1851_v36 = vpack.c.bf16 %v2017_v3, %v2015_v58  ;;  %v1291_v23 = vld [vmem:[%s2343_s14 + $0x30] sm:$0xff] }
 0x248   : > { %v2021_v7 = vpop.eup %2020  ;;  %2040 = vpow2.f32 %v1216_v20  ;;  %v1293_v20 = vld [vmem:[%s2343_s14 + $0x40] sm:$0xff] }
 0x249   : > { %v2023_v49 = vpop.eup %2022  ;;  %2042 = vpow2.f32 %v1218_v0  ;;  %v1233_v37 = vadd.f32 %v2629_v28, %v1232_v30  ;;  %1852 = vmatprep.subr.bf16.mxu1 %v1851_v36  ;;  %v1855_v15 = vpack.c.bf16 %v2021_v7, %v2019_v6  ;;  %v1296_v0 = vld [vmem:[%s2343_s14 + $0x58] sm:$0xff]  ;;  %v1297_v36 = vld [vmem:[%s2343_s14 + $0x60] sm:$0xff] }
 0x24a   : > { %v2025_v21 = vpop.eup %2024  ;;  %2044 = vpow2.f32 %v1220_v5  ;;  %1854 = vmatpush3.bf16.msra.mxu1 %v1853_v27  ;;  %v1298_v5 = vld [vmem:[%s2343_s14 + $0x68] sm:$0xff] }
 0x24b   : > { %v2027_v40 = vpop.eup %2026  ;;  %v1234_v16 = vadd.f32 %v2637_v52, %v1233_v37  ;;  %1856 = vmatprep.subr.bf16.mxu1 %v1855_v15  ;;  %v1859_v38 = vpack.c.bf16 %v2025_v21, %v2023_v49  ;;  %v1287_v52 = vld [vmem:[%s2343_s14 + $0x10] sm:$0xff]  ;;  %v1300_v37 = vld [vmem:[%s2343_s14 + $0x78] sm:$0xff] }
 0x24c   : > { %v2029_v24 = vpop.eup %2028 }
 0x24d   : > { %v2031_v26 = vpop.eup %2030  ;;  %v1235_v31 = vadd.f32 %v2642_v35, %v1234_v16  ;;  %v1863_v43 = vpack.c.bf16 %v2029_v24, %v2027_v40 }
 0x24e   : > { %v2033_v56 = vpop.eup %2032  ;;  %1858 = vmatpush3.bf16.msra.mxu1 %v1857_v53 }
 0x24f   : > { %v2035_v44 = vpop.eup %2034  ;;  %v1236_v54 = vadd.f32 %v2650_v60, %v1235_v31  ;;  %1860 = vmatprep.subr.bf16.mxu1 %v1859_v38  ;;  %v1867_v13 = vpack.c.bf16 %v2033_v56, %v2031_v26  ;;  %v1264_v31 = vld [vmem:[#allocation4 + $0x8] sm:$0xff] }
 0x250   : > { %v2037_v18 = vpop.eup %2036 }
 0x251   : > { %v2039_v27 = vpop.eup %2038  ;;  %v1237_v2 = vadd.f32 %v2655_v45, %v1236_v54  ;;  %v1871_v9 = vpack.c.bf16 %v2037_v18, %v2035_v44 }
 0x252   : > { %v2041_v19 = vpop.eup %2040  ;;  %1862 = vmatpush3.bf16.msra.mxu1 %v1861_v63 }
 0x253   : > { %v2043_v17 = vpop.eup %2042  ;;  %v1238_v51 = vadd.f32 %v2663_v62, %v1237_v2  ;;  %1864 = vmatprep.subr.bf16.mxu1 %v1863_v43  ;;  %v1875_v22 = vpack.c.bf16 %v2041_v19, %v2039_v27 }
 0x254   : > { %v2045_v29 = vpop.eup %2044 }
 0x255   : > { %v1239_v53 = vadd.f32 %v2015_v58, %v1238_v51  ;;  %v1879_v4 = vpack.c.bf16 %v2045_v29, %v2043_v17 }
 0x256   : > { %1866 = vmatpush3.bf16.msra.mxu1 %v1865_v42  ;;  %v1285_v42 = vld [vmem:[%s2343_s14] sm:$0xff] }
 0x257   : > { %v1240_v25 = vadd.f32 %v2017_v3, %v1239_v53  ;;  %1868 = vmatprep.subr.bf16.mxu1 %v1867_v13  ;;  %v1265_v13 = vld [vmem:[#allocation4 + $0x10] sm:$0xff] }
 0x259   : > { %v1241_v1 = vadd.f32 %v2019_v6, %v1240_v25  ;;  %v1222_v6 = vld [vmem:[#allocation3] sm:$0x1]  ;;  %v1267_v25 = vld [vmem:[#allocation4 + $0x20] sm:$0xff] }
 0x25a   : > { %1870 = vmatpush3.bf16.msra.mxu1 %v1869_v50  ;;  %v1288_v50 = vld [vmem:[%s2343_s14 + $0x18] sm:$0xff] }
 0x25b   : > { %v1242_v46 = vadd.f32 %v2021_v7, %v1241_v1  ;;  %1872 = vmatprep.subr.bf16.mxu1 %v1871_v9  ;;  %v1223_v7 = vmul.f32 %v2581_v59, %v1222_v6  ;;  %v1278_v59 = vmul.f32 %v2585_v8, %v1264_v31  ;;  %v1279_v9 = vmul.f32 %v2585_v8, %v1265_v13 }
 0x25d   : > { %v1243_v47 = vadd.f32 %v2023_v49, %v1242_v46 }
 0x25e   : > { %1874 = vmatpush3.bf16.msra.mxu1 %v1873_v55  ;;  %v1289_v55 = vld [vmem:[%s2343_s14 + $0x20] sm:$0xff] }
 0x25f   : > { %v1244_v63 = vadd.f32 %v2025_v21, %v1243_v47  ;;  %1876 = vmatprep.subr.bf16.mxu1 %v1875_v22  ;;  %v1299_v21 = vld [vmem:[%s2343_s14 + $0x70] sm:$0xff] }
 0x261   : > { %v1245_v57 = vadd.f32 %v2027_v40, %v1244_v63  ;;  %v1263_v40 = vld [vmem:[#allocation4] sm:$0xff]  ;;  %v1281_v63 = vmul.f32 %v2585_v8, %v1267_v25 }
 0x262   : > { %1878 = vmatpush3.bf16.msra.mxu1 %v1877_v61  ;;  %v1294_v61 = vld [vmem:[%s2343_s14 + $0x48] sm:$0xff] }
 0x263   : > { %v1246_v11 = vadd.f32 %v2029_v24, %v1245_v57  ;;  %1880 = vmatprep.subr.bf16.mxu1 %v1879_v4  ;;  %v1277_v24 = vmul.f32 %v2585_v8, %v1263_v40 }
 0x265   : > { %v1247_v39 = vadd.f32 %v2031_v26, %v1246_v11  ;;  %v1268_v11 = vld [vmem:[#allocation4 + $0x28] sm:$0xff] }
 0x266   : > { %1882 = vmatpush3.bf16.msra.mxu1 %v1881_v34  ;;  %v1295_v34 = vld [vmem:[%s2343_s14 + $0x50] sm:$0xff] }
 0x267   : > { %v1248_v48 = vadd.f32 %v2033_v56, %v1247_v39 }
 0x269   : > { %v1249_v28 = vadd.f32 %v2035_v44, %v1248_v48  ;;  %1366 = vmatmul.mubr.f32.vlgmr.msra.gmra.mrb[0].mxu1 %v1285_v42 }
 0x26a   : > { %1370 = vmatprep.mubr.f32.mxu1 %v1288_v50  ;;  %v1282_v50 = vmul.f32 %v2585_v8, %v1268_v11 }
 0x26b   : > { %v1250_v14 = vadd.f32 %v2037_v18, %v1249_v28 }
 0x26d   : > { %v1251_v35 = vadd.f32 %v2039_v27, %v1250_v14  ;;  %1371 = vmatmul.mubr.f32.gmra.mrb[2].mxu1 %v1287_v52  ;;  %v1269_v52 = vld [vmem:[#allocation4 + $0x30] sm:$0xff] }
 0x26e   : > { %1375 = vmatprep.mubr.f32.mxu1 %v1290_v33 }
 0x26f   : > { %v1252_v60 = vadd.f32 %v2041_v19, %v1251_v35 }
 0x271   : > { %v1253_v45 = vadd.f32 %v2043_v17, %v1252_v60  ;;  %1376 = vmatmul.mubr.f32.gmra.mrb[4].mxu1 %v1289_v55  ;;  %v1266_v17 = vld [vmem:[#allocation4 + $0x18] sm:$0xff]  ;;  %v1283_v55 = vmul.f32 %v2585_v8, %v1269_v52 }
 0x272   : > { %1380 = vmatprep.mubr.f32.mxu1 %v1292_v12  ;;  %v1280_v53 = vmul.f32 %v2585_v8, %v1266_v17  ;;  %v1270_v12 = vld [vmem:[#allocation4 + $0x38] sm:$0xff] }
 0x273   : > { %v1254_v41 = vadd.f32 %v2045_v29, %v1253_v45 }
 0x275   : > { %v1255_v62 = vrot.slane %v1254_v41, 4  ;;  %1381 = vmatmul.mubr.f32.gmra.mrb[6].mxu1 %v1291_v23 }
 0x276   : > { %1385 = vmatprep.mubr.f32.mxu1 %v1294_v61  ;;  %v1284_v61 = vmul.f32 %v2585_v8, %v1270_v12  ;;  %v1462_v8 = vld [vmem:[%s2341_s15 + $0x18] sm:$0xff] (!%p1699_p6) }
 0x277   : > { %v1256_v58 = vadd.f32 %v1255_v62, %v1254_v41  ;;  %1466 = vst [vmem:[%s2345_s18 + $0x58] sm:$0xff] (!%p1699_p6), %v1462_v8 }
 0x279   : > { %v1257_v32 = vrot.slane %v1256_v58, 2  ;;  %1386 = vmatmul.mubr.f32.gmra.mrb[8].mxu1 %v1293_v20 }
 0x27a   : > { %1390 = vmatprep.mubr.f32.mxu1 %v1296_v0  ;;  %v1459_v0 = vld [vmem:[%s2341_s15] sm:$0xff] (!%p1699_p6) }
 0x27b   : > { %v1258_v3 = vadd.f32 %v1257_v32, %v1256_v58  ;;  %v1460_v32 = vld [vmem:[%s2341_s15 + $0x8] sm:$0xff] (!%p1699_p6)  ;;  %1463 = vst [vmem:[%s2345_s18 + $0x40] sm:$0xff] (!%p1699_p6), %v1459_v0 }
 0x27c   : > { %1464 = vst [vmem:[%s2345_s18 + $0x48] sm:$0xff] (!%p1699_p6), %v1460_v32 }
 0x27d   : > { %v1259_v30 = vrot.slane %v1258_v3, 1  ;;  %1391 = vmatmul.mubr.f32.gmra.mrb[10].mxu1 %v1295_v34  ;;  %v1461_v34 = vld [vmem:[%s2341_s15 + $0x10] sm:$0xff] (!%p1699_p6) }
 0x27e   : > { %1395 = vmatprep.mubr.f32.mxu1 %v1298_v5  ;;  %1465 = vst [vmem:[%s2345_s18 + $0x50] sm:$0xff] (!%p1699_p6), %v1461_v34 }
 0x27f   : > { %v1260_v49 = vadd.f32 %v1259_v30, %v1258_v3 }
 0x281   : > { %v1261_v15 = vadd.f32 %v1260_v49, %v1223_v7  ;;  %1396 = vmatmul.mubr.f32.gmra.mrb[12].mxu1 %v1297_v36 }
 0x282   : > { %1400 = vmatprep.mubr.f32.mxu1 %v1300_v37 }
 0x283   : > { %1262 = vst [vmem:[#allocation3] sm:$0x1] %v1261_v15 }
 0x285   : > { %1401 = vmatmul.mubr.f32.gmra.mrb[14].mxu1 %v1299_v21 }
 0x28a   : > { %v1427_v58 = vld [vmem:[#allocation3] sm:$0x1] (!%p1699_p6) }
 0x28b   : > { %2046 = vrcp.f32 (!%p1699_p6), %v1427_v58 }
 0x295   : > { %v2047_v6 = vpop.eup (!%p1699_p6), %2046 }
 0x296   : > { %v1441_v49 = vrot.slane (!%p1699_p6), %v2047_v6, %v2512_v10 }
 0x33c   : > { %v1771_v16 = vpop.f32.mrb[0].mxu1 }
 0x33d   : > { %v1772_v38 = vpop.f32.mrb[1].mxu1 }
 0x33e   : > { %v1773_v26 = vadd.f32 %v1772_v38, %v1771_v16 }
 0x340   : > { %v1406_v43 = vadd.f32 %v1773_v26, %v1277_v24  ;;  %v1774_v56 = vpop.f32.mrb[2].mxu1 }
 0x341   : > { %v1775_v44 = vpop.f32.mrb[3].mxu1 }
 0x342   : > { %1414 = vst [vmem:[#allocation4] sm:$0xff] %v1406_v43  ;;  %v1776_v54 = vadd.f32 %v1775_v44, %v1774_v56 }
 0x344   : > { %v1407_v18 = vadd.f32 %v1776_v54, %v1278_v59  ;;  %v1777_v27 = vpop.f32.mrb[4].mxu1 }
 0x345   : > { %v1778_v2 = vpop.f32.mrb[5].mxu1 }
 0x346   : > { %1415 = vst [vmem:[#allocation4 + $0x8] sm:$0xff] %v1407_v18  ;;  %v1779_v19 = vadd.f32 %v1778_v2, %v1777_v27 }
 0x348   : > { %v1408_v51 = vadd.f32 %v1779_v19, %v1279_v9  ;;  %v1780_v22 = vpop.f32.mrb[6].mxu1 }
 0x349   : > { %v1781_v29 = vpop.f32.mrb[7].mxu1  ;;  %v1429_v3 = vld [vmem:[#allocation4] sm:$0xff] (!%p1699_p6) }
 0x34a   : > { %1416 = vst [vmem:[#allocation4 + $0x10] sm:$0xff] %v1408_v51  ;;  %v1782_v4 = vadd.f32 %v1781_v29, %v1780_v22  ;;  %v1443_v40 = vmul.f32 (!%p1699_p6), %v1441_v49, %v1429_v3 }
 0x34c   : > { %v1409_v1 = vadd.f32 %v1782_v4, %v1280_v53  ;;  %v1783_v46 = vpop.f32.mrb[8].mxu1  ;;  %1451 = vst [vmem:[%s2345_s18] sm:$0xff] (!%p1699_p6), %v1443_v40 }
 0x34d   : > { %v1784_v47 = vpop.f32.mrb[9].mxu1  ;;  %v1430_v5 = vld [vmem:[#allocation4 + $0x8] sm:$0xff] (!%p1699_p6) }
 0x34e   : > { %1417 = vst [vmem:[#allocation4 + $0x18] sm:$0xff] %v1409_v1  ;;  %v1785_v57 = vadd.f32 %v1784_v47, %v1783_v46  ;;  %v1444_v16 = vmul.f32 (!%p1699_p6), %v1441_v49, %v1430_v5 }
 0x350   : > { %v1410_v39 = vadd.f32 %v1785_v57, %v1281_v63  ;;  %v1786_v42 = vpop.f32.mrb[10].mxu1  ;;  %1452 = vst [vmem:[%s2345_s18 + $0x8] sm:$0xff] (!%p1699_p6), %v1444_v16 }
 0x351   : > { %v1787_v48 = vpop.f32.mrb[11].mxu1  ;;  %v1431_v30 = vld [vmem:[#allocation4 + $0x10] sm:$0xff] (!%p1699_p6) }
 0x352   : > { %1418 = vst [vmem:[#allocation4 + $0x20] sm:$0xff] %v1410_v39  ;;  %v1788_v28 = vadd.f32 %v1787_v48, %v1786_v42  ;;  %v1445_v38 = vmul.f32 (!%p1699_p6), %v1441_v49, %v1431_v30 }
 0x354   : > { %v1411_v14 = vadd.f32 %v1788_v28, %v1282_v50  ;;  %v1789_v33 = vpop.f32.mrb[12].mxu1  ;;  %1453 = vst [vmem:[%s2345_s18 + $0x10] sm:$0xff] (!%p1699_p6), %v1445_v38 }
 0x355   : > { %v1790_v35 = vpop.f32.mrb[13].mxu1  ;;  %v1432_v36 = vld [vmem:[#allocation4 + $0x18] sm:$0xff] (!%p1699_p6) }
 0x356   : > { %1419 = vst [vmem:[#allocation4 + $0x28] sm:$0xff] %v1411_v14  ;;  %v1791_v60 = vadd.f32 %v1790_v35, %v1789_v33  ;;  %v1446_v24 = vmul.f32 (!%p1699_p6), %v1441_v49, %v1432_v36 }
 0x358   : > { %v1412_v45 = vadd.f32 %v1791_v60, %v1283_v55  ;;  %v1792_v23 = vpop.f32.mrb[14].mxu1  ;;  %1426 = sbr.rel (%p1699_p6) target bundleno = 873 (0x369), region = 94  ;;  %1454 = vst [vmem:[%s2345_s18 + $0x18] sm:$0xff] (!%p1699_p6), %v1446_v24 }
 0x359   : > { %v1793_v41 = vpop.f32.mrb[15].mxu1  ;;  %v1433_v7 = vld [vmem:[#allocation4 + $0x20] sm:$0xff] (!%p1699_p6) }
 0x35a   : > { %1420 = vst [vmem:[#allocation4 + $0x30] sm:$0xff] %v1412_v45  ;;  %v1794_v62 = vadd.f32 %v1793_v41, %v1792_v23  ;;  %v1447_v26 = vmul.f32 (!%p1699_p6), %v1441_v49, %v1433_v7 }
 0x35c   : > { %v1413_v20 = vadd.f32 %v1794_v62, %v1284_v61  ;;  %1455 = vst [vmem:[%s2345_s18 + $0x20] sm:$0xff] (!%p1699_p6), %v1447_v26 }
 0x35d   : > { %v1434_v37 = vld [vmem:[#allocation4 + $0x28] sm:$0xff] (!%p1699_p6) }
 0x35e   : > { %1421 = vst [vmem:[#allocation4 + $0x38] sm:$0xff] %v1413_v20  ;;  %v1448_v31 = vmul.f32 (!%p1699_p6), %v1441_v49, %v1434_v37 }
 0x360   : > { %1456 = vst [vmem:[%s2345_s18 + $0x28] sm:$0xff] %v1448_v31 }
 0x361   : > { %v1435_v15 = vld [vmem:[#allocation4 + $0x30] sm:$0xff] }
 0x362   : > { %v1449_v43 = vmul.f32 %v1441_v49, %v1435_v15 }
 0x364   : > { %1457 = vst [vmem:[%s2345_s18 + $0x30] sm:$0xff] %v1449_v43 }
 0x365   : > { %v1436_v21 = vld [vmem:[#allocation4 + $0x38] sm:$0xff] }
 0x366   : > { %v1450_v56 = vmul.f32 %v1441_v49, %v1436_v21 }
 0x368   : > { %1458 = vst [vmem:[%s2345_s18 + $0x38] sm:$0xff] %v1450_v56 }
 0x369 PF: > { %s1884_s3 = smul.u32 1536, %s2146_s24  ;;  %s1482_s20 = sshll.u32 %s2345_s18, 4  ;;  %s2754_s20 = int_to_ptr.vmem [resolvable:$true] %s1482_s20 }
 0x36a   : > { %s2848_s26 = sand.u32 1, %s2126_s19   ;;  %s2048_s15 = scalar_lea.vmem %s2754_s20, 1536 }
 0x36b   : > { %s2752_s25 = scalar_lea.hbm %s2821_s5, %s1884_s3  ;;  %s2758_s14 = scalar_lea.sflag [#allocation8], %s2848_s26 }
 0x36c   : > { %p2049_p8 = scmp.ne.s32.totalorder %s2754_s20, %s2048_s15  ;;  %s2163_s24 = smov [#allocation7]  }
 0x36d   : > { %s2052_s18 = sshll.u32 %s2163_s24, 4  ;;  %s2053_s18 = int_to_ptr.vmem [resolvable:$false] %s2052_s18 }
 0x36e   : > { %p2050_p9 = pnand %p2049_p8, %p2268_p7  ;;  %s2054_s16 = scalar_lea.vmem %s2053_s18, 3072 }
 0x36f   : > { %p2055_p11 = scmp.lt.s32.totalorder %s2754_s20, %s2053_s18  ;;  %p2056_p13 = scmp.lt.s32.totalorder %s2054_s16, %s2048_s15 }
 0x370   : > { %p2051_p10 = pneg %p2050_p9 }
 0x371   : > { %p2057_p0 = por %p2056_p13, %p2055_p11 }
 0x373   : > { %p2058_p1 = pnand %p2057_p0, %p2051_p10 }
 0x375   : > { %2061 = shalt.err (!%p2058_p1)
}
 0x376   : > { %s2062_s7 = scalar_lea.hbm %s2752_s25, 1536  ;;  %s2066_s0 = scalar_lea.hbm %s2821_s5, 3072 }
 0x377   : > { %p2063_p2 = scmp.ne.s32.totalorder %s2752_s25, %s2062_s7  ;;  %p2067_p5 = scmp.lt.u32.totalorder %s2752_s25, %s2821_s5 }
 0x378   : > { %p2068_p6 = scmp.lt.u32.totalorder %s2066_s0, %s2062_s7  ;;  %p2070_p9 = scmp.lt.u32.totalorder %s2062_s7, %s2752_s25 }
 0x379   : > { %p2064_p3 = pnand %p2063_p2, %p2268_p7 }
 0x37a   : > { %p2069_p8 = por %p2068_p6, %p2067_p5 }
 0x37b   : > { %p2065_p4 = pneg %p2064_p3 }
 0x37c   : > { %p2071_p10 = por %p2070_p9, %p2069_p8 }
 0x37e   : > { %p2072_p11 = pnand %p2071_p10, %p2065_p4 }
 0x380   : > { %2075 = shalt.err (!%p2072_p11)
}
 0x381   : > { %s2164_s12 = smov 128   ;;  %s2165_s13 = smov 8  }
 0x382   : > { %1885 = dma.vmem_to_hbm [thread:$0]  (%p2268_p7), %s2754_s20, 1536, %s2752_s25, %s2758_s14, %s2164_s12, %s2164_s12, %s2165_s13  }
 0x383 PF: > { %s2849_s10 = sld [smem:[#allocation10_spill]]  ;;  %p1891_p13 = scmp.ge.s32.totalorder %s2158_s27, 2 }
 0x385   : > { %p1888_p0 = pnand %p1891_p13, %p2276_p12 }
 0x389   : > { %s1497_s30 = sand.u32 1, %s2849_s10  }
 0x38a   : > { %s1498_s21 = scalar_lea.sflag [#allocation8], %s1497_s30 }
 0x38b   : > { %2117 = dma.done.wait (!%p1888_p0), %s1498_s21, 1536  }
 0x38c   : > { %2119 = vsyncadd (!%p1888_p0), %s1498_s21, 4294965760  ;;  %s18_s27 = sadd.s32 1, %s2158_s27   ;;  %s2851_s9 = sld [smem:[#allocation11_spill]] }
 0x38d   : > { %p15_p1 = scmp.ge.s32.totalorder %s18_s27, 6   ;;  %s2852_s20 = sld [smem:[#allocation18_spill]] }
 0x38e   : > { %s2853_s21 = sld [smem:[#allocation12_spill]]  ;;  %s2854_s22 = sld [smem:[#allocation19_spill]] }
 0x38f   : > { %s2855_s23 = sld [smem:[#allocation13_spill]]  ;;  %s2856_s24 = sld [smem:[#allocation14_spill]] }
 0x390   : > { %s2857_s25 = sld [smem:[#allocation15_spill]]  ;;  %s2858_s26 = sld [smem:[#allocation16_spill]] }
 0x391   : > { %s2859_s18 = smov %s2126_s19  ;;  %17 = sbr.rel (!%p15_p1) target bundleno = 9 (0x9), region = 151 }
 0x392   : > { %s2860_s19 = smov %s2851_s9 }
 0x398   :  { %1503 = vsyncpa [#allocation8], 1 }
 0x399   :  { %1505 = vsyncpa [#allocation8 + $0x1], 1 }

</bundles_post_ra>
